<compile_context>
chip_gen: v6e
topology: v6e:2x2x1
jax: 0.10.0
libtpu: 0.0.40
codegen_flags: <defaults>
</compile_context>

<pallas_src>
import numpy as np
import jax
import jax.numpy as jnp
from jax.experimental import pallas as pl
from jax.experimental.pallas import tpu as pltpu


# ----------------------------- fused kernel --------------------------------
def _fused_kernel(x_ref, w1_ref, b1_ref,
                  s2_ref, w2_ref, b2_ref,
                  m4_ref, w4_ref, b4_ref,
                  s5_ref, w5_ref, b5_ref,
                  wfc_ref, bfc_ref, o_ref):
    f32 = jnp.float32
    x1 = x_ref[...]                                              # (57, 66) im2col

    # conv1 + ReLU + MaxPool1d(1,13): single packed matmul (32,57)@(57,66).
    p1 = jnp.maximum(
        jnp.dot(w1_ref[...], x1, preferred_element_type=f32) + b1_ref[...],
        0.0)                                                      # (32, 66)

    # conv2 + ReLU + MaxPool1d(1,13): gather the pooled taps with 3 tiny 0/1
    # matmuls, stack them on the contraction dim, one packed (64,96)@(96,6).
    g2 = jnp.concatenate(
        [jnp.dot(p1, s2_ref[k], preferred_element_type=f32) for k in range(3)],
        axis=0)                                                   # (96, 6)
    p2 = jnp.maximum(
        jnp.dot(w2_ref[...], g2, preferred_element_type=f32) + b2_ref[...],
        0.0)                                                      # (64, 6)

    # conv4 on the transposed activation, computed directly in transposed
    # orientation (the two torch.transpose(1,2) are removed algebraically):
    #   g4[k*64 + c, m] = p2[c + k - 1, m]   via one stacked 0/1 shift matmul.
    g4 = jnp.dot(m4_ref[...], p2, preferred_element_type=f32)     # (192, 6)
    c4 = p2.shape[0]
    acc4 = jnp.dot(g4[0:c4, :], w4_ref[0], preferred_element_type=f32)
    acc4 = acc4 + jnp.dot(g4[c4:2 * c4, :], w4_ref[1],
                          preferred_element_type=f32)
    acc4 = acc4 + jnp.dot(g4[2 * c4:3 * c4, :], w4_ref[2],
                          preferred_element_type=f32)
    i5 = jnp.maximum(acc4 + b4_ref[...], 0.0)                     # (64, 10)

    # conv5 (no ReLU): shift-gather the taps, one packed (15,192)@(192,10).
    g5 = jnp.concatenate(
        [jnp.dot(i5, s5_ref[k], preferred_element_type=f32) for k in range(3)],
        axis=0)                                                   # (192, 10)
    o5 = jnp.dot(w5_ref[...], g5, preferred_element_type=f32) + b5_ref[...]  # (15,10)

    # flatten(start_dim=1) + Linear(150,100) + ReLU as ONE contraction:
    # build the row-major flattened (1,150) vector with static row slices +
    # lane concatenation, then a single (1,150)@(150,100) matmul.
    flat = jnp.concatenate([o5[r:r + 1, :] for r in range(o5.shape[0])],
                           axis=1)                                # (1, 150)
    out = jnp.dot(flat, wfc_ref[...], preferred_element_type=f32) + bfc_ref[...]
    o_ref[...] = jnp.maximum(out, 0.0).astype(o_ref.dtype)        # (1, 100)


# --------------------------- parameter packing ------------------------------
def _gather_taps(n_in, n_out, stride):
    """g[k, i, j] = 1 iff i == stride*j + k - 1 (out-of-range == zero pad)."""
    g = np.zeros((3, n_in, n_out), np.float32)
    for k in range(3):
        for j in range(n_out):
            i = stride * j + k - 1
            if 0 <= i < n_in:
                g[k, i, j] = 1.0
    return g


def prepare_params(p, length):
    """One-time packing of weights and constant gather/shift matrices."""
    w1, b1 = p["w1"], p["b1"]        # (32,19,3), (32,)
    w2, b2 = p["w2"], p["b2"]        # (64,32,3), (64,)
    w4, b4 = p["w4"], p["b4"]        # (10, 6,3), (10,)
    w5, b5 = p["w5"], p["b5"]        # (15,64,3), (15,)
    fcw, fcb = p["fcw"], p["fcb"]    # (100,150), (100,)

    n1 = (length - 1) // 13 + 1      # length after first pool  (66)
    n2 = (n1 - 1) // 13 + 1          # length after second pool (6)
    assert n2 == w4.shape[1], "pooled length must equal conv4 in_channels"
    l4 = w2.shape[0]                 # conv4 spatial length == conv2 Cout (64)
    l5 = w4.shape[0]                 # conv5 spatial length == conv4 Cout (10)
    assert l4 == w5.shape[1] and fcw.shape[1] == w5.shape[0] * l5

    return dict(
        # conv1: weights packed to match the wrapper-side (3*Cin, 66) im2col.
        w1r=jnp.transpose(w1, (0, 2, 1)).reshape(w1.shape[0], -1),     # (32,57)
        b1=b1.reshape(-1, 1),                                          # (32,1)
        # conv2: pooled-tap gather matrices + im2col-packed weight.
        s2=jnp.asarray(_gather_taps(n1, n2, 13)),                      # (3,66,6)
        w2r=jnp.transpose(w2, (0, 2, 1)).reshape(w2.shape[0], -1),     # (64,96)
        b2=b2.reshape(-1, 1),                                          # (64,1)
        # conv4 (transposed orientation): stacked shift operator + taps.
        m4s=jnp.asarray(np.transpose(_gather_taps(l4, l4, 1),
                                     (0, 2, 1)).reshape(3 * l4, l4)),  # (192,64)
        w4t=jnp.transpose(w4, (2, 1, 0)),                              # (3,6,10)
        b4=b4.reshape(1, -1),                                          # (1,10)
        # conv5: shift gathers + im2col-packed weight.
        s5=jnp.asarray(_gather_taps(l5, l5, 1)),                       # (3,10,10)
        w5c=jnp.transpose(w5, (0, 2, 1)).reshape(w5.shape[0], -1),     # (15,192)
        b5=b5.reshape(-1, 1),                                          # (15,1)
        # flatten + fc.
        wfc=jnp.transpose(fcw),                                        # (150,100)
        bfc=fcb.reshape(1, -1),                                        # (1,100)
    )


# ------------------------------- wrapper -------------------------------------
def _zero_map(nd):
    def im(i):
        return (0,) * nd
    return im


def eeg_forward(x, pk):
    B, cin, length = x.shape
    n1 = (length - 1) // 13 + 1
    n_feat = pk["bfc"].shape[1]

    # Stride-13 subsample / im2col for conv1 + pool in the XLA wrapper:
    # three cheap lane-strided slices replace the old (846,66) 0/1 matmuls.
    xp = jnp.pad(x, ((0, 0), (0, 0), (1, 1)))
    stop = 13 * (n1 - 1) + 1
    x1 = jnp.concatenate([xp[:, :, k:k + stop:13] for k in range(3)],
                         axis=1)                                   # (B, 3*cin, 66)

    consts = [pk[k] for k in ("w1r", "b1", "s2", "w2r", "b2", "m4s", "w4t",
                              "b4", "s5", "w5c", "b5", "wfc", "bfc")]
    rows, cols = x1.shape[1], x1.shape[2]

    out = pl.pallas_call(
        _fused_kernel,
        out_shape=jax.ShapeDtypeStruct((B, 1, n_feat), x.dtype),
        grid=(B,),
        in_specs=[pl.BlockSpec((None, rows, cols), lambda i: (i, 0, 0))]
                 + [pl.BlockSpec(a.shape, _zero_map(a.ndim)) for a in consts],
        out_specs=pl.BlockSpec((None, 1, n_feat), lambda i: (i, 0, 0)),
        # On v7x use CORE_PARALLEL (or pl.core_map) to put the two batch
        # elements on the two TensorCores; plain "parallel" kept here so the
        # kernel runs on every TPU generation.
        compiler_params=pltpu.CompilerParams(
            dimension_semantics=("parallel",)),
    )(x1, *consts)
    return out.reshape(B, n_feat)


# ---------------- pure-JAX reference for verification ----------------
def _conv1d_ref(x, w, b):
    L = x.shape[-1]
    xp = jnp.pad(x, ((0, 0), (0, 0), (1, 1)))
    out = (jnp.einsum("oi,bil->bol", w[:, :, 0], xp[:, :, 0:L])
           + jnp.einsum("oi,bil->bol", w[:, :, 1], xp[:, :, 1:L + 1])
           + jnp.einsum("oi,bil->bol", w[:, :, 2], xp[:, :, 2:L + 2]))
    return out + b[None, :, None]


def eeg_forward_ref(x, p):
    h = jax.nn.relu(_conv1d_ref(x, p["w1"], p["b1"]))[:, :, ::13]
    h = jax.nn.relu(_conv1d_ref(h, p["w2"], p["b2"]))[:, :, ::13]
    h = jnp.transpose(h, (0, 2, 1))
    h = jax.nn.relu(_conv1d_ref(h, p["w4"], p["b4"]))
    h = jnp.transpose(h, (0, 2, 1))
    h = _conv1d_ref(h, p["w5"], p["b5"])
    h = h.reshape(h.shape[0], -1)
    return jax.nn.relu(h @ p["fcw"].T + p["fcb"])


if __name__ == "__main__":
    key = jax.random.PRNGKey(0)
    keys = jax.random.split(key, 7)

    # Smallest input length consistent with the module: two stride-13 pools
    # must yield length 6 (conv4 has 6 input channels) -> L1 = 66 -> L = 846.
    B, C_IN, L = 2, 19, 846
    x = jax.random.normal(keys[0], (B, C_IN, L), jnp.float32)

    def init_conv(k, cout, cin):
        kw, kb = jax.random.split(k)
        bound = 1.0 / (cin * 3) ** 0.5
        w = jax.random.uniform(kw, (cout, cin, 3), jnp.float32, -bound, bound)
        bb = jax.random.uniform(kb, (cout,), jnp.float32, -bound, bound)
        return w, bb

    w1, b1 = init_conv(keys[1], 32, 19)
    w2, b2 = init_conv(keys[2], 64, 32)
    w4, b4 = init_conv(keys[3], 10, 6)
    w5, b5 = init_conv(keys[4], 15, 64)
    kfw, kfb = jax.random.split(keys[5])
    fc_bound = 1.0 / 150.0 ** 0.5
    fcw = jax.random.uniform(kfw, (100, 150), jnp.float32, -fc_bound, fc_bound)
    fcb = jax.random.uniform(kfb, (100,), jnp.float32, -fc_bound, fc_bound)

    params = dict(w1=w1, b1=b1, w2=w2, b2=b2, w4=w4, b4=b4, w5=w5, b5=b5,
                  fcw=fcw, fcb=fcb)
    packed = prepare_params(params, L)          # one-time weight packing

    out = jax.block_until_ready(jax.jit(eeg_forward)(x, packed))
    ref = jax.block_until_ready(eeg_forward_ref(x, params))

    assert out.shape == (B, 100), out.shape
    if not bool(jnp.allclose(out, ref, atol=1e-4, rtol=1e-4)):
        raise SystemExit("Pallas output does not match reference")
    print("KERNEL_OK")
</pallas_src>

<mosaic_0001>
module attributes {stable_mosaic.version = 11 : i64} {
  func.func @_fused_kernel(%arg0: i32, %arg1: memref<1x57x66xf32, #tpu.memory_space<vmem>>, %arg2: memref<32x57xf32, #tpu.memory_space<vmem>>, %arg3: memref<32x1xf32, #tpu.memory_space<vmem>>, %arg4: memref<3x66x6xf32, #tpu.memory_space<vmem>>, %arg5: memref<64x96xf32, #tpu.memory_space<vmem>>, %arg6: memref<64x1xf32, #tpu.memory_space<vmem>>, %arg7: memref<192x64xf32, #tpu.memory_space<vmem>>, %arg8: memref<3x6x10xf32, #tpu.memory_space<vmem>>, %arg9: memref<1x10xf32, #tpu.memory_space<vmem>>, %arg10: memref<3x10x10xf32, #tpu.memory_space<vmem>>, %arg11: memref<15x192xf32, #tpu.memory_space<vmem>>, %arg12: memref<15x1xf32, #tpu.memory_space<vmem>>, %arg13: memref<150x100xf32, #tpu.memory_space<vmem>>, %arg14: memref<1x100xf32, #tpu.memory_space<vmem>>, %arg15: memref<1x1x100xf32, #tpu.memory_space<vmem>>) attributes {dimension_semantics = [#tpu.dimension_semantics<parallel>], iteration_bounds = array<i64: 2>, scalar_prefetch = 0 : i64, scratch_operands = 0 : i64, tpu.core_type = #tpu.core_type<tc>, window_params = [{transform_indices = @transform_0, window_bounds = array<i64: 1, 57, 66>}, {pipeline_mode = #tpu.pipeline_mode<synchronous>, transform_indices = @transform_1, window_bounds = array<i64: 32, 57>}, {pipeline_mode = #tpu.pipeline_mode<synchronous>, transform_indices = @transform_2, window_bounds = array<i64: 32, 1>}, {pipeline_mode = #tpu.pipeline_mode<synchronous>, transform_indices = @transform_3, window_bounds = array<i64: 3, 66, 6>}, {pipeline_mode = #tpu.pipeline_mode<synchronous>, transform_indices = @transform_4, window_bounds = array<i64: 64, 96>}, {pipeline_mode = #tpu.pipeline_mode<synchronous>, transform_indices = @transform_5, window_bounds = array<i64: 64, 1>}, {pipeline_mode = #tpu.pipeline_mode<synchronous>, transform_indices = @transform_6, window_bounds = array<i64: 192, 64>}, {pipeline_mode = #tpu.pipeline_mode<synchronous>, transform_indices = @transform_7, window_bounds = array<i64: 3, 6, 10>}, {pipeline_mode = #tpu.pipeline_mode<synchronous>, transform_indices = @transform_8, window_bounds = array<i64: 1, 10>}, {pipeline_mode = #tpu.pipeline_mode<synchronous>, transform_indices = @transform_9, window_bounds = array<i64: 3, 10, 10>}, {pipeline_mode = #tpu.pipeline_mode<synchronous>, transform_indices = @transform_10, window_bounds = array<i64: 15, 192>}, {pipeline_mode = #tpu.pipeline_mode<synchronous>, transform_indices = @transform_11, window_bounds = array<i64: 15, 1>}, {pipeline_mode = #tpu.pipeline_mode<synchronous>, transform_indices = @transform_12, window_bounds = array<i64: 150, 100>}, {pipeline_mode = #tpu.pipeline_mode<synchronous>, transform_indices = @transform_13, window_bounds = array<i64: 1, 100>}, {transform_indices = @transform_14, window_bounds = array<i64: 1, 1, 100>}]} {
    %c0 = arith.constant 0 : index
    %c0_0 = arith.constant 0 : index
    %c0_1 = arith.constant 0 : index
    %0 = vector.load %arg1[%c0, %c0_0, %c0_1] : memref<1x57x66xf32, #tpu.memory_space<vmem>>, vector<1x57x66xf32>
    %1 = vector.shape_cast %0 : vector<1x57x66xf32> to vector<57x66xf32>
    %c0_2 = arith.constant 0 : index
    %c0_3 = arith.constant 0 : index
    %2 = vector.load %arg2[%c0_2, %c0_3] : memref<32x57xf32, #tpu.memory_space<vmem>>, vector<32x57xf32>
    %cst = arith.constant dense<0.000000e+00> : vector<32x66xf32>
    %3 = tpu.matmul %2, %1, %cst {dimension_numbers = #tpu.dot_dimension_numbers<[1], [0], [0], [1], [0, 0, 1, 1], [], []>} : vector<32x57xf32>, vector<57x66xf32>, vector<32x66xf32> -> vector<32x66xf32>
    %c0_4 = arith.constant 0 : index
    %c0_5 = arith.constant 0 : index
    %4 = vector.load %arg3[%c0_4, %c0_5] : memref<32x1xf32, #tpu.memory_space<vmem>>, vector<32x1xf32>
    %5 = vector.broadcast %4 : vector<32x1xf32> to vector<32x66xf32>
    %6 = arith.addf %3, %5 : vector<32x66xf32>
    %cst_6 = arith.constant 0.000000e+00 : f32
    %7 = vector.broadcast %cst_6 : f32 to vector<32x66xf32>
    %8 = arith.maximumf %6, %7 : vector<32x66xf32>
    %c0_7 = arith.constant 0 : index
    %c0_8 = arith.constant 0 : index
    %c0_9 = arith.constant 0 : index
    %9 = vector.load %arg4[%c0_7, %c0_8, %c0_9] : memref<3x66x6xf32, #tpu.memory_space<vmem>>, vector<1x66x6xf32>
    %10 = vector.shape_cast %9 : vector<1x66x6xf32> to vector<66x6xf32>
    %cst_10 = arith.constant dense<0.000000e+00> : vector<32x6xf32>
    %11 = tpu.matmul %8, %10, %cst_10 {dimension_numbers = #tpu.dot_dimension_numbers<[1], [0], [0], [1], [0, 0, 1, 1], [], []>} : vector<32x66xf32>, vector<66x6xf32>, vector<32x6xf32> -> vector<32x6xf32>
    %c1 = arith.constant 1 : index
    %c0_11 = arith.constant 0 : index
    %c0_12 = arith.constant 0 : index
    %12 = vector.load %arg4[%c1, %c0_11, %c0_12] : memref<3x66x6xf32, #tpu.memory_space<vmem>>, vector<1x66x6xf32>
    %13 = vector.shape_cast %12 : vector<1x66x6xf32> to vector<66x6xf32>
    %cst_13 = arith.constant dense<0.000000e+00> : vector<32x6xf32>
    %14 = tpu.matmul %8, %13, %cst_13 {dimension_numbers = #tpu.dot_dimension_numbers<[1], [0], [0], [1], [0, 0, 1, 1], [], []>} : vector<32x66xf32>, vector<66x6xf32>, vector<32x6xf32> -> vector<32x6xf32>
    %c2 = arith.constant 2 : index
    %c0_14 = arith.constant 0 : index
    %c0_15 = arith.constant 0 : index
    %15 = vector.load %arg4[%c2, %c0_14, %c0_15] : memref<3x66x6xf32, #tpu.memory_space<vmem>>, vector<1x66x6xf32>
    %16 = vector.shape_cast %15 : vector<1x66x6xf32> to vector<66x6xf32>
    %cst_16 = arith.constant dense<0.000000e+00> : vector<32x6xf32>
    %17 = tpu.matmul %8, %16, %cst_16 {dimension_numbers = #tpu.dot_dimension_numbers<[1], [0], [0], [1], [0, 0, 1, 1], [], []>} : vector<32x66xf32>, vector<66x6xf32>, vector<32x6xf32> -> vector<32x6xf32>
    %18 = tpu.concatenate %11, %14, %17 in 0 : vector<32x6xf32>, vector<32x6xf32>, vector<32x6xf32> -> vector<96x6xf32>
    %c0_17 = arith.constant 0 : index
    %c0_18 = arith.constant 0 : index
    %19 = vector.load %arg5[%c0_17, %c0_18] : memref<64x96xf32, #tpu.memory_space<vmem>>, vector<64x96xf32>
    %cst_19 = arith.constant dense<0.000000e+00> : vector<64x6xf32>
    %20 = tpu.matmul %19, %18, %cst_19 {dimension_numbers = #tpu.dot_dimension_numbers<[1], [0], [0], [1], [0, 0, 1, 1], [], []>} : vector<64x96xf32>, vector<96x6xf32>, vector<64x6xf32> -> vector<64x6xf32>
    %c0_20 = arith.constant 0 : index
    %c0_21 = arith.constant 0 : index
    %21 = vector.load %arg6[%c0_20, %c0_21] : memref<64x1xf32, #tpu.memory_space<vmem>>, vector<64x1xf32>
    %22 = vector.broadcast %21 : vector<64x1xf32> to vector<64x6xf32>
    %23 = arith.addf %20, %22 : vector<64x6xf32>
    %cst_22 = arith.constant 0.000000e+00 : f32
    %24 = vector.broadcast %cst_22 : f32 to vector<64x6xf32>
    %25 = arith.maximumf %23, %24 : vector<64x6xf32>
    %c0_23 = arith.constant 0 : index
    %c0_24 = arith.constant 0 : index
    %26 = vector.load %arg7[%c0_23, %c0_24] : memref<192x64xf32, #tpu.memory_space<vmem>>, vector<192x64xf32>
    %cst_25 = arith.constant dense<0.000000e+00> : vector<192x6xf32>
    %27 = tpu.matmul %26, %25, %cst_25 {dimension_numbers = #tpu.dot_dimension_numbers<[1], [0], [0], [1], [0, 0, 1, 1], [], []>} : vector<192x64xf32>, vector<64x6xf32>, vector<192x6xf32> -> vector<192x6xf32>
    %28 = vector.extract_strided_slice %27 {offsets = [0, 0], sizes = [64, 6], strides = [1, 1]} : vector<192x6xf32> to vector<64x6xf32>
    %c0_26 = arith.constant 0 : index
    %c0_27 = arith.constant 0 : index
    %c0_28 = arith.constant 0 : index
    %29 = vector.load %arg8[%c0_26, %c0_27, %c0_28] : memref<3x6x10xf32, #tpu.memory_space<vmem>>, vector<1x6x10xf32>
    %30 = vector.shape_cast %29 : vector<1x6x10xf32> to vector<6x10xf32>
    %cst_29 = arith.constant dense<0.000000e+00> : vector<64x10xf32>
    %31 = tpu.matmul %28, %30, %cst_29 {dimension_numbers = #tpu.dot_dimension_numbers<[1], [0], [0], [1], [0, 0, 1, 1], [], []>} : vector<64x6xf32>, vector<6x10xf32>, vector<64x10xf32> -> vector<64x10xf32>
    %32 = vector.extract_strided_slice %27 {offsets = [64, 0], sizes = [64, 6], strides = [1, 1]} : vector<192x6xf32> to vector<64x6xf32>
    %c1_30 = arith.constant 1 : index
    %c0_31 = arith.constant 0 : index
    %c0_32 = arith.constant 0 : index
    %33 = vector.load %arg8[%c1_30, %c0_31, %c0_32] : memref<3x6x10xf32, #tpu.memory_space<vmem>>, vector<1x6x10xf32>
    %34 = vector.shape_cast %33 : vector<1x6x10xf32> to vector<6x10xf32>
    %cst_33 = arith.constant dense<0.000000e+00> : vector<64x10xf32>
    %35 = tpu.matmul %32, %34, %cst_33 {dimension_numbers = #tpu.dot_dimension_numbers<[1], [0], [0], [1], [0, 0, 1, 1], [], []>} : vector<64x6xf32>, vector<6x10xf32>, vector<64x10xf32> -> vector<64x10xf32>
    %36 = arith.addf %31, %35 : vector<64x10xf32>
    %37 = vector.extract_strided_slice %27 {offsets = [128, 0], sizes = [64, 6], strides = [1, 1]} : vector<192x6xf32> to vector<64x6xf32>
    %c2_34 = arith.constant 2 : index
    %c0_35 = arith.constant 0 : index
    %c0_36 = arith.constant 0 : index
    %38 = vector.load %arg8[%c2_34, %c0_35, %c0_36] : memref<3x6x10xf32, #tpu.memory_space<vmem>>, vector<1x6x10xf32>
    %39 = vector.shape_cast %38 : vector<1x6x10xf32> to vector<6x10xf32>
    %cst_37 = arith.constant dense<0.000000e+00> : vector<64x10xf32>
    %40 = tpu.matmul %37, %39, %cst_37 {dimension_numbers = #tpu.dot_dimension_numbers<[1], [0], [0], [1], [0, 0, 1, 1], [], []>} : vector<64x6xf32>, vector<6x10xf32>, vector<64x10xf32> -> vector<64x10xf32>
    %41 = arith.addf %36, %40 : vector<64x10xf32>
    %c0_38 = arith.constant 0 : index
    %c0_39 = arith.constant 0 : index
    %42 = vector.load %arg9[%c0_38, %c0_39] : memref<1x10xf32, #tpu.memory_space<vmem>>, vector<1x10xf32>
    %43 = vector.broadcast %42 : vector<1x10xf32> to vector<64x10xf32>
    %44 = arith.addf %41, %43 : vector<64x10xf32>
    %cst_40 = arith.constant 0.000000e+00 : f32
    %45 = vector.broadcast %cst_40 : f32 to vector<64x10xf32>
    %46 = arith.maximumf %44, %45 : vector<64x10xf32>
    %c0_41 = arith.constant 0 : index
    %c0_42 = arith.constant 0 : index
    %c0_43 = arith.constant 0 : index
    %47 = vector.load %arg10[%c0_41, %c0_42, %c0_43] : memref<3x10x10xf32, #tpu.memory_space<vmem>>, vector<1x10x10xf32>
    %48 = vector.shape_cast %47 : vector<1x10x10xf32> to vector<10x10xf32>
    %cst_44 = arith.constant dense<0.000000e+00> : vector<64x10xf32>
    %49 = tpu.matmul %46, %48, %cst_44 {dimension_numbers = #tpu.dot_dimension_numbers<[1], [0], [0], [1], [0, 0, 1, 1], [], []>} : vector<64x10xf32>, vector<10x10xf32>, vector<64x10xf32> -> vector<64x10xf32>
    %c1_45 = arith.constant 1 : index
    %c0_46 = arith.constant 0 : index
    %c0_47 = arith.constant 0 : index
    %50 = vector.load %arg10[%c1_45, %c0_46, %c0_47] : memref<3x10x10xf32, #tpu.memory_space<vmem>>, vector<1x10x10xf32>
    %51 = vector.shape_cast %50 : vector<1x10x10xf32> to vector<10x10xf32>
    %cst_48 = arith.constant dense<0.000000e+00> : vector<64x10xf32>
    %52 = tpu.matmul %46, %51, %cst_48 {dimension_numbers = #tpu.dot_dimension_numbers<[1], [0], [0], [1], [0, 0, 1, 1], [], []>} : vector<64x10xf32>, vector<10x10xf32>, vector<64x10xf32> -> vector<64x10xf32>
    %c2_49 = arith.constant 2 : index
    %c0_50 = arith.constant 0 : index
    %c0_51 = arith.constant 0 : index
    %53 = vector.load %arg10[%c2_49, %c0_50, %c0_51] : memref<3x10x10xf32, #tpu.memory_space<vmem>>, vector<1x10x10xf32>
    %54 = vector.shape_cast %53 : vector<1x10x10xf32> to vector<10x10xf32>
    %cst_52 = arith.constant dense<0.000000e+00> : vector<64x10xf32>
    %55 = tpu.matmul %46, %54, %cst_52 {dimension_numbers = #tpu.dot_dimension_numbers<[1], [0], [0], [1], [0, 0, 1, 1], [], []>} : vector<64x10xf32>, vector<10x10xf32>, vector<64x10xf32> -> vector<64x10xf32>
    %56 = tpu.concatenate %49, %52, %55 in 0 : vector<64x10xf32>, vector<64x10xf32>, vector<64x10xf32> -> vector<192x10xf32>
    %c0_53 = arith.constant 0 : index
    %c0_54 = arith.constant 0 : index
    %57 = vector.load %arg11[%c0_53, %c0_54] : memref<15x192xf32, #tpu.memory_space<vmem>>, vector<15x192xf32>
    %cst_55 = arith.constant dense<0.000000e+00> : vector<15x10xf32>
    %58 = tpu.matmul %57, %56, %cst_55 {dimension_numbers = #tpu.dot_dimension_numbers<[1], [0], [0], [1], [0, 0, 1, 1], [], []>} : vector<15x192xf32>, vector<192x10xf32>, vector<15x10xf32> -> vector<15x10xf32>
    %c0_56 = arith.constant 0 : index
    %c0_57 = arith.constant 0 : index
    %59 = vector.load %arg12[%c0_56, %c0_57] : memref<15x1xf32, #tpu.memory_space<vmem>>, vector<15x1xf32>
    %60 = vector.broadcast %59 : vector<15x1xf32> to vector<15x10xf32>
    %61 = arith.addf %58, %60 : vector<15x10xf32>
    %62 = vector.extract_strided_slice %61 {offsets = [0, 0], sizes = [1, 10], strides = [1, 1]} : vector<15x10xf32> to vector<1x10xf32>
    %63 = vector.extract_strided_slice %61 {offsets = [1, 0], sizes = [1, 10], strides = [1, 1]} : vector<15x10xf32> to vector<1x10xf32>
    %64 = vector.extract_strided_slice %61 {offsets = [2, 0], sizes = [1, 10], strides = [1, 1]} : vector<15x10xf32> to vector<1x10xf32>
    %65 = vector.extract_strided_slice %61 {offsets = [3, 0], sizes = [1, 10], strides = [1, 1]} : vector<15x10xf32> to vector<1x10xf32>
    %66 = vector.extract_strided_slice %61 {offsets = [4, 0], sizes = [1, 10], strides = [1, 1]} : vector<15x10xf32> to vector<1x10xf32>
    %67 = vector.extract_strided_slice %61 {offsets = [5, 0], sizes = [1, 10], strides = [1, 1]} : vector<15x10xf32> to vector<1x10xf32>
    %68 = vector.extract_strided_slice %61 {offsets = [6, 0], sizes = [1, 10], strides = [1, 1]} : vector<15x10xf32> to vector<1x10xf32>
    %69 = vector.extract_strided_slice %61 {offsets = [7, 0], sizes = [1, 10], strides = [1, 1]} : vector<15x10xf32> to vector<1x10xf32>
    %70 = vector.extract_strided_slice %61 {offsets = [8, 0], sizes = [1, 10], strides = [1, 1]} : vector<15x10xf32> to vector<1x10xf32>
    %71 = vector.extract_strided_slice %61 {offsets = [9, 0], sizes = [1, 10], strides = [1, 1]} : vector<15x10xf32> to vector<1x10xf32>
    %72 = vector.extract_strided_slice %61 {offsets = [10, 0], sizes = [1, 10], strides = [1, 1]} : vector<15x10xf32> to vector<1x10xf32>
    %73 = vector.extract_strided_slice %61 {offsets = [11, 0], sizes = [1, 10], strides = [1, 1]} : vector<15x10xf32> to vector<1x10xf32>
    %74 = vector.extract_strided_slice %61 {offsets = [12, 0], sizes = [1, 10], strides = [1, 1]} : vector<15x10xf32> to vector<1x10xf32>
    %75 = vector.extract_strided_slice %61 {offsets = [13, 0], sizes = [1, 10], strides = [1, 1]} : vector<15x10xf32> to vector<1x10xf32>
    %76 = vector.extract_strided_slice %61 {offsets = [14, 0], sizes = [1, 10], strides = [1, 1]} : vector<15x10xf32> to vector<1x10xf32>
    %77 = tpu.concatenate %62, %63, %64, %65, %66, %67, %68, %69, %70, %71, %72, %73, %74, %75, %76 in 1 : vector<1x10xf32>, vector<1x10xf32>, vector<1x10xf32>, vector<1x10xf32>, vector<1x10xf32>, vector<1x10xf32>, vector<1x10xf32>, vector<1x10xf32>, vector<1x10xf32>, vector<1x10xf32>, vector<1x10xf32>, vector<1x10xf32>, vector<1x10xf32>, vector<1x10xf32>, vector<1x10xf32> -> vector<1x150xf32>
    %c0_58 = arith.constant 0 : index
    %c0_59 = arith.constant 0 : index
    %78 = vector.load %arg13[%c0_58, %c0_59] : memref<150x100xf32, #tpu.memory_space<vmem>>, vector<150x100xf32>
    %cst_60 = arith.constant dense<0.000000e+00> : vector<1x100xf32>
    %79 = tpu.matmul %77, %78, %cst_60 {dimension_numbers = #tpu.dot_dimension_numbers<[1], [0], [0], [1], [0, 0, 1, 1], [], []>} : vector<1x150xf32>, vector<150x100xf32>, vector<1x100xf32> -> vector<1x100xf32>
    %c0_61 = arith.constant 0 : index
    %c0_62 = arith.constant 0 : index
    %80 = vector.load %arg14[%c0_61, %c0_62] : memref<1x100xf32, #tpu.memory_space<vmem>>, vector<1x100xf32>
    %81 = arith.addf %79, %80 : vector<1x100xf32>
    %cst_63 = arith.constant 0.000000e+00 : f32
    %82 = vector.broadcast %cst_63 : f32 to vector<1x100xf32>
    %83 = arith.maximumf %81, %82 : vector<1x100xf32>
    %c0_64 = arith.constant 0 : index
    %c0_65 = arith.constant 0 : index
    %c0_66 = arith.constant 0 : index
    %84 = vector.load %arg15[%c0_64, %c0_65, %c0_66] : memref<1x1x100xf32, #tpu.memory_space<vmem>>, vector<1x1x100xf32>
    %85 = vector.shape_cast %84 : vector<1x1x100xf32> to vector<1x100xf32>
    %86 = vector.shape_cast %83 : vector<1x100xf32> to vector<1x1x100xf32>
    tpu.vector_store %arg15[%c0_64, %c0_65, %c0_66], %86 {strides = array<i32>} : memref<1x1x100xf32, #tpu.memory_space<vmem>>, vector<1x1x100xf32>,
    return
  }
  func.func @transform_0(%arg0: i32) -> (i32, i32, i32) {
    %c0_i32 = arith.constant 0 : i32
    %c0_i32_0 = arith.constant 0 : i32
    %c0_i32_1 = arith.constant 0 : i32
    return %arg0, %c0_i32, %c0_i32_0 : i32, i32, i32
  }
  func.func @transform_1(%arg0: i32) -> (i32, i32) {
    %c0_i32 = arith.constant 0 : i32
    %c0_i32_0 = arith.constant 0 : i32
    %c0_i32_1 = arith.constant 0 : i32
    return %c0_i32, %c0_i32_0 : i32, i32
  }
  func.func @transform_2(%arg0: i32) -> (i32, i32) {
    %c0_i32 = arith.constant 0 : i32
    %c0_i32_0 = arith.constant 0 : i32
    %c0_i32_1 = arith.constant 0 : i32
    return %c0_i32, %c0_i32_0 : i32, i32
  }
  func.func @transform_3(%arg0: i32) -> (i32, i32, i32) {
    %c0_i32 = arith.constant 0 : i32
    %c0_i32_0 = arith.constant 0 : i32
    %c0_i32_1 = arith.constant 0 : i32
    %c0_i32_2 = arith.constant 0 : i32
    return %c0_i32, %c0_i32_0, %c0_i32_1 : i32, i32, i32
  }
  func.func @transform_4(%arg0: i32) -> (i32, i32) {
    %c0_i32 = arith.constant 0 : i32
    %c0_i32_0 = arith.constant 0 : i32
    %c0_i32_1 = arith.constant 0 : i32
    return %c0_i32, %c0_i32_0 : i32, i32
  }
  func.func @transform_5(%arg0: i32) -> (i32, i32) {
    %c0_i32 = arith.constant 0 : i32
    %c0_i32_0 = arith.constant 0 : i32
    %c0_i32_1 = arith.constant 0 : i32
    return %c0_i32, %c0_i32_0 : i32, i32
  }
  func.func @transform_6(%arg0: i32) -> (i32, i32) {
    %c0_i32 = arith.constant 0 : i32
    %c0_i32_0 = arith.constant 0 : i32
    %c0_i32_1 = arith.constant 0 : i32
    return %c0_i32, %c0_i32_0 : i32, i32
  }
  func.func @transform_7(%arg0: i32) -> (i32, i32, i32) {
    %c0_i32 = arith.constant 0 : i32
    %c0_i32_0 = arith.constant 0 : i32
    %c0_i32_1 = arith.constant 0 : i32
    %c0_i32_2 = arith.constant 0 : i32
    return %c0_i32, %c0_i32_0, %c0_i32_1 : i32, i32, i32
  }
  func.func @transform_8(%arg0: i32) -> (i32, i32) {
    %c0_i32 = arith.constant 0 : i32
    %c0_i32_0 = arith.constant 0 : i32
    %c0_i32_1 = arith.constant 0 : i32
    return %c0_i32, %c0_i32_0 : i32, i32
  }
  func.func @transform_9(%arg0: i32) -> (i32, i32, i32) {
    %c0_i32 = arith.constant 0 : i32
    %c0_i32_0 = arith.constant 0 : i32
    %c0_i32_1 = arith.constant 0 : i32
    %c0_i32_2 = arith.constant 0 : i32
    return %c0_i32, %c0_i32_0, %c0_i32_1 : i32, i32, i32
  }
  func.func @transform_10(%arg0: i32) -> (i32, i32) {
    %c0_i32 = arith.constant 0 : i32
    %c0_i32_0 = arith.constant 0 : i32
    %c0_i32_1 = arith.constant 0 : i32
    return %c0_i32, %c0_i32_0 : i32, i32
  }
  func.func @transform_11(%arg0: i32) -> (i32, i32) {
    %c0_i32 = arith.constant 0 : i32
    %c0_i32_0 = arith.constant 0 : i32
    %c0_i32_1 = arith.constant 0 : i32
    return %c0_i32, %c0_i32_0 : i32, i32
  }
  func.func @transform_12(%arg0: i32) -> (i32, i32) {
    %c0_i32 = arith.constant 0 : i32
    %c0_i32_0 = arith.constant 0 : i32
    %c0_i32_1 = arith.constant 0 : i32
    return %c0_i32, %c0_i32_0 : i32, i32
  }
  func.func @transform_13(%arg0: i32) -> (i32, i32) {
    %c0_i32 = arith.constant 0 : i32
    %c0_i32_0 = arith.constant 0 : i32
    %c0_i32_1 = arith.constant 0 : i32
    return %c0_i32, %c0_i32_0 : i32, i32
  }
  func.func @transform_14(%arg0: i32) -> (i32, i32, i32) {
    %c0_i32 = arith.constant 0 : i32
    %c0_i32_0 = arith.constant 0 : i32
    %c0_i32_1 = arith.constant 0 : i32
    return %arg0, %c0_i32, %c0_i32_0 : i32, i32, i32
  }
}

</mosaic_0001>

<bundles_post_ra>
// kernel: eeg_forward.1
= control target key start
LH: loop header
LB: loop body
LE: loop exit
PB: predicated region body
PF: predicated region fallthrough
CT: control target
= control target key end

     0   :  { %s3935_s0 = inlined_call_operand.vmem [shape: f32[2,57,66], index: 0, kind: input, shape index: {}]   ;;  %s3936_s1 = inlined_call_operand.vmem [shape: f32[32,57], index: 1, kind: input, shape index: {}]   ;;  %s3937_s2 = inlined_call_operand.vmem [shape: f32[32,1], index: 2, kind: input, shape index: {}]   ;;  %s3938_s3 = inlined_call_operand.vmem [shape: f32[3,66,6], index: 3, kind: input, shape index: {}]   ;;  %s3939_s4 = inlined_call_operand.vmem [shape: f32[64,96], index: 4, kind: input, shape index: {}]   ;;  %s3940_s5 = inlined_call_operand.vmem [shape: f32[64,1], index: 5, kind: input, shape index: {}]   ;;  %s3941_s6 = inlined_call_operand.vmem [shape: f32[192,64], index: 6, kind: input, shape index: {}]   ;;  %s3942_s7 = inlined_call_operand.vmem [shape: f32[3,6,10], index: 7, kind: input, shape index: {}]   ;;  %s3943_s8 = inlined_call_operand.vmem [shape: f32[1,10], index: 8, kind: input, shape index: {}]   ;;  %s3944_s9 = inlined_call_operand.vmem [shape: f32[3,10,10], index: 9, kind: input, shape index: {}]   ;;  %s3945_s10 = inlined_call_operand.vmem [shape: f32[15,192], index: 10, kind: input, shape index: {}]   ;;  %s3946_s11 = inlined_call_operand.vmem [shape: f32[15,1], index: 11, kind: input, shape index: {}]   ;;  %s3947_s12 = inlined_call_operand.vmem [shape: f32[150,100], index: 12, kind: input, shape index: {}]   ;;  %s3948_s13 = inlined_call_operand.vmem [shape: f32[1,100], index: 13, kind: input, shape index: {}]   ;;  %s3949_s14 = inlined_call_operand.hbm [shape: f32[2,1,100], index: 14, kind: output, shape index: {}]  }
   0x1   :  { %3954 = sst [smem:[#allocation9_spill]] %s3935_s0 }
   0x2   :  { %19 = vsyncpa [#allocation3], 0 }
   0x3   :  { %21 = vsyncpa [#allocation3 + $0x1], 0  ;;  %s3334_s29 = smov 0   ;;  %s3336_s30 = smov 0  }
   0x4   :  { %s3338_s15 = smov 0   ;;  %s3340_s16 = smov 0  }
   0x5 LB: > { %3955 = sst [smem:[#allocation5_spill]] %s3236_s15  ;;  %s3355_s17 = sadd.s32 4294967295, %s3240_s16   ;;  %s3240_s16 = sphi %s3340_s16, %s3963_s16   ;;  %s3236_s15 = sphi %s3338_s15, %s3965_s15   ;;  %s3232_s30 = sphi %s3336_s30, %s3967_s30   ;;  %s3228_s29 = sphi %s3334_s29, %s3966_s29  }
   0x6   : > { %s2530_s18 = sadd.s32 4294967294, %s3240_s16   ;;  %s3359_s19 = sadd.s32 1, %s3240_s16  }
   0x7   : > { %3956 = sst [smem:[#allocation6_spill]] %s3359_s19  ;;  %s333_s20 = sadd.s32 1, %s3236_s15 }
   0x8   : > { %s330_s21 = ssub.s32 %s3240_s16, %s3359_s19  ;;  %p343_p0 = scmp.ne.s32.totalorder %s3236_s15, %s3232_s30 }
   0x9   : > { %p331_p1 = scmp.eq.s32.totalorder %s330_s21, 0  ;;  %p344_p2 = scmp.eq.s32.totalorder %s3355_s17, 1 }
   0xa   : > { %p349_p3 = scmp.ne.s32.totalorder %s3232_s30, %s3228_s29  ;;  %p350_p4 = scmp.eq.s32.totalorder %s2530_s18, 1 }
   0xb   : > { %s3370_s22 = scalar_select %p331_p1, %s3236_s15, %s333_s20  }
   0xc   : > { %p3372_p5 = por %p344_p2, %p343_p0  ;;  %p3376_p6 = por %p350_p4, %p349_p3 }
   0xd   : > { %3957 = sst [smem:[#allocation7_spill]] %s3370_s22  ;;  %p2533_p7 = scmp.ge.s32.totalorder %s3240_s16, 1 }
   0xe   : > { %s3959_s24 = scalar_select %p3376_p6, 1, 0 }
   0xf   : > { %p415_p8 = scmp.lt.s32.totalorder %s3240_s16, 3 }
  0x10   : > { %3960 = sst [smem:[#allocation8_spill]] %s3959_s24 }
  0x11   : > { %p416_p9 = pnand %p2533_p7, %p415_p8 }
  0x12   : > { %p460_p10 = scmp.lt.s32.totalorder (!%p416_p9), %s3355_s17, 1  ;;  %s3961_s0 = sld [smem:[#allocation9_spill]] (!%p416_p9) }
  0x13   : > { %419 = sbr.rel (%p416_p9) target bundleno = 1937 (0x791), region = 76  ;;  %s3244_s15 = smov (!%p416_p9), 20  }
  0x14   : > { %s3246_s25 = smov (!%p416_p9), 40   ;;  %s3247_s26 = smov (!%p416_p9), 30  }
  0x15   : > { %s3248_s20 = smov (!%p416_p9), 60   ;;  %s3250_s21 = smov (!%p416_p9), 80  }
  0x16   : > { %s3256_s19 = smov (!%p416_p9), 12   ;;  %s458_s24 = sand.u32 (!%p416_p9), 1, %s3232_s30  }
  0x17   : > { %s459_s28 = scalar_lea.vmem (!%p416_p9), [#allocation2], %s458_s24 }
  0x18   : > { %v473_v0 = vld [vmem:[%s3936_s1] sm:$0xff]  ;;  %vm501_vm0 = vcmask 465920   ;;  %s461_s18 = scalar_select %p460_p10, %s3355_s17, 1  ;;  %v3242_v2 = vmov 0   ;;  %v479_v3 = vld [vmem:[%s3937_s2 + $0x10] sm:$0xff]  ;;  %vm514_vm1 = vcmask 1040384  }
  0x19   : > { %2851 = vmatprep.mubr.msk.f32.mxu0 %vm501_vm0, %v473_v0  ;;  %v477_v1 = vld [vmem:[%s3937_s2] sm:$0xff]  ;;  %3178 = vset.pattern.permute.xlu0 %v3242_v2  ;;  %v478_v4 = vld [vmem:[%s3937_s2 + $0x8] sm:$0xff]  ;;  %v480_v5 = vld [vmem:[%s3937_s2 + $0x18] sm:$0xff]  ;;  %vm629_vm2 = vcmask 1041408   ;;  %vm616_vm3 = vcmask 539648   ;;  %vm970_vm4 = vcmask 785408  }
  0x1a   : > { %3179 = vset.pattern.permute.xlu1 %v3242_v2  ;;  %483 = vperm.xlu0 %3178, %v477_v1   ;;  %s2674_s22 = sshll.u32 %s461_s18, 6  ;;  %v929_v9 = vld [vmem:[%s3940_s5 + $0x38] sm:$0xff]  ;;  %v928_v10 = vld [vmem:[%s3940_s5 + $0x30] sm:$0xff]  ;;  %v615_v12 = vld [vmem:[%s3938_s3 + $0x40] sm:$0x3]  ;;  %vm1132_vm5 = vcmask 523264  }
  0x1b   : > { %493 = vperm.xlu1 %3179, %v479_v3   ;;  %s3400_s27 = scalar_lea.vmem %s3961_s0, %s2674_s22  ;;  %v927_v14 = vld [vmem:[%s3940_s5 + $0x28] sm:$0xff]  ;;  %v926_v15 = vld [vmem:[%s3940_s5 + $0x20] sm:$0xff]  ;;  %2857 = vmatprep.subr.msk.mxu1 %vm629_vm2, %v615_v12  ;;  %v614_v17 = vld [vmem:[%s3938_s3 + $0x38] sm:$0xff]  ;;  %vm1418_vm6 = vcmask 1045504   ;;  %vm1393_vm7 = vcmask 48128   ;;  %vm1826_vm8 = vcmask 80896  }
  0x1c   : > { %v472_v6 = vld [vmem:[%s3400_s27 + $0x38] sm:$0x1]  ;;  %v471_v7 = vld [vmem:[%s3400_s27 + $0x30] sm:$0xff]  ;;  %v470_v8 = vld [vmem:[%s3400_s27 + $0x28] sm:$0xff]  ;;  %2858 = vmatpush3.msk.msra.mxu1 %vm629_vm2, %v615_v12  ;;  %s3252_s18 = smov 100   ;;  %s3257_s22 = smov 110  }
  0x1d   : > { %2835 = vmatprep.subr.msk.mxu0 %vm514_vm1, %v472_v6  ;;  %v469_v11 = vld [vmem:[%s3400_s27 + $0x20] sm:$0xff]  ;;  %v468_v13 = vld [vmem:[%s3400_s27 + $0x18] sm:$0xff]  ;;  %v467_v16 = vld [vmem:[%s3400_s27 + $0x10] sm:$0xff]  ;;  %2859 = vmatprep.subr.mxu1 %v614_v17  ;;  %vm2336_vm9 = vcmask 162816   ;;  %vm2338_vm10 = vcmask 244736   ;;  %vm2340_vm11 = vcmask 326656  }
  0x1e   : > { %488 = vperm.xlu0 %3178, %v478_v4   ;;  %2836 = vmatpush3.msk.msra.mxu0 %vm514_vm1, %v472_v6  ;;  %v466_v18 = vld [vmem:[%s3400_s27 + $0x8] sm:$0xff]  ;;  %v925_v19 = vld [vmem:[%s3940_s5 + $0x18] sm:$0xff]  ;;  %v924_v20 = vld [vmem:[%s3940_s5 + $0x10] sm:$0xff]  ;;  %vm2342_vm12 = vcmask 408576   ;;  %vm2344_vm13 = vcmask 490496   ;;  %vm2346_vm14 = vcmask 572416  }
  0x1f   : > { %498 = vperm.xlu1 %3179, %v480_v5   ;;  %2837 = vmatprep.subr.mxu0 %v471_v7  ;;  %v465_v21 = vld [vmem:[%s3400_s27] sm:$0xff]  ;;  %v613_v22 = vld [vmem:[%s3938_s3 + $0x30] sm:$0xff]  ;;  %v474_v23 = vld [vmem:[%s3936_s1 + $0x8] sm:$0xff]  ;;  %s3245_s27 = smov 10   ;;  %vm2348_vm15 = vcmask 654336   ;;  %vm2358_vm1 = vcmask 15360  }
  0x20   : > { %2838 = vmatpush3.msra.mxu0 %v471_v7  ;;  %2860 = vmatpush3.msra.mxu1 %v614_v17  ;;  %v923_v24 = vld [vmem:[%s3940_s5 + $0x8] sm:$0xff]  ;;  %v475_v25 = vld [vmem:[%s3936_s1 + $0x10] sm:$0xff]  ;;  %v922_v26 = vld [vmem:[%s3940_s5] sm:$0xff] }
  0x21   : > { %2839 = vmatprep.subr.mxu0 %v470_v8  ;;  %2861 = vmatprep.subr.mxu1 %v613_v22  ;;  %v2554_v27 = vld [vmem:[%s3938_s3 + $0x88] sm:$0x3]  ;;  %v476_v29 = vld [vmem:[%s3936_s1 + $0x18] sm:$0xff]  ;;  %v2185_v30 = vld [vmem:[%s3946_s11] sm:$0xff] }
  0x22   : > { %967 = vperm.xlu0 %3178, %v929_v9   ;;  %2840 = vmatpush3.msra.mxu0 %v470_v8  ;;  %v612_v28 = vld [vmem:[%s3938_s3 + $0x28] sm:$0xff]  ;;  %v2553_v32 = vld [vmem:[%s3938_s3 + $0x80] sm:$0xff]  ;;  %v2552_v34 = vld [vmem:[%s3938_s3 + $0x78] sm:$0xff] }
  0x23   : > { %962 = vperm.xlu1 %3179, %v928_v10   ;;  %2841 = vmatprep.subr.mxu0 %v469_v11  ;;  %v2186_v31 = vld [vmem:[%s3946_s11 + $0x8] sm:$0x7f]  ;;  %v611_v33 = vld [vmem:[%s3938_s3 + $0x20] sm:$0xff]  ;;  %v610_v35 = vld [vmem:[%s3938_s3 + $0x18] sm:$0xff] }
  0x24   : > { %2842 = vmatpush3.msra.mxu0 %v469_v11  ;;  %2862 = vmatpush3.msra.mxu1 %v613_v22  ;;  %v2551_v36 = vld [vmem:[%s3938_s3 + $0x70] sm:$0xff]  ;;  %v2550_v37 = vld [vmem:[%s3938_s3 + $0x68] sm:$0xff]  ;;  %v2549_v38 = vld [vmem:[%s3938_s3 + $0x60] sm:$0xff] }
  0x25   : > { %2843 = vmatprep.subr.mxu0 %v468_v13  ;;  %2863 = vmatprep.subr.mxu1 %v612_v28  ;;  %v609_v39 = vld [vmem:[%s3938_s3 + $0x10] sm:$0xff]  ;;  %v2548_v40 = vld [vmem:[%s3938_s3 + $0x58] sm:$0xff]  ;;  %v608_v41 = vld [vmem:[%s3938_s3 + $0x8] sm:$0xff] }
  0x26   : > { %957 = vperm.xlu0 %3178, %v927_v14   ;;  %2844 = vmatpush3.msra.mxu0 %v468_v13  ;;  %v2547_v42 = vld [vmem:[%s3938_s3 + $0x50] sm:$0xff]  ;;  %v607_v43 = vld [vmem:[%s3938_s3] sm:$0xff]  ;;  %v2546_v44 = vld [vmem:[%s3938_s3 + $0x48] sm:$0xff] }
  0x27   : > { %952 = vperm.xlu1 %3179, %v926_v15   ;;  %2845 = vmatprep.subr.mxu0 %v467_v16  ;;  %v2568_v45 = vld [vmem:[%s3938_s3 + $0xd0] sm:$0x3]  ;;  %v2567_v60 = vld [vmem:[%s3938_s3 + $0xc8] sm:$0xff]  ;;  %v2566_v63 = vld [vmem:[%s3938_s3 + $0xc0] sm:$0xff] }
  0x28   : > { %2846 = vmatpush3.msra.mxu0 %v467_v16  ;;  %2864 = vmatpush3.msra.mxu1 %v612_v28  ;;  %v2565_v0 = vld [vmem:[%s3938_s3 + $0xb8] sm:$0xff]  ;;  %v2564_v1 = vld [vmem:[%s3938_s3 + $0xb0] sm:$0xff]  ;;  %v2563_v2 = vld [vmem:[%s3938_s3 + $0xa8] sm:$0xff] }
  0x29   : > { %2847 = vmatprep.subr.mxu0 %v466_v18  ;;  %2865 = vmatprep.subr.mxu1 %v611_v33  ;;  %v2562_v3 = vld [vmem:[%s3938_s3 + $0xa0] sm:$0xff]  ;;  %v2561_v4 = vld [vmem:[%s3938_s3 + $0x98] sm:$0xff]  ;;  %v2560_v5 = vld [vmem:[%s3938_s3 + $0x90] sm:$0xff] }
  0x2a   : > { %947 = vperm.xlu0 %3178, %v925_v19   ;;  %2848 = vmatpush3.msra.mxu0 %v466_v18  ;;  %v914_v6 = vld [vmem:[%s3939_s4] sm:$0xff]  ;;  %v915_v19 = vld [vmem:[%s3939_s4 + $0x8] sm:$0xff] }
  0x2b   : > { %942 = vperm.xlu1 %3179, %v924_v20   ;;  %2849 = vmatprep.subr.mxu0 %v465_v21  ;;  %v916_v20 = vld [vmem:[%s3939_s4 + $0x10] sm:$0xff]  ;;  %v918_v22 = vld [vmem:[%s3939_s4 + $0x20] sm:$0xff] }
  0x2c   : > { %2850 = vmatpush3.msra.mxu0 %v465_v21  ;;  %2866 = vmatpush3.msra.mxu1 %v611_v33  ;;  %v917_v21 = vld [vmem:[%s3939_s4 + $0x18] sm:$0xff] }
  0x2d   : > { %2852 = vmatmul.mubr.msk.f32.vlgmr.msra.gmra.mxu0 %vm501_vm0, %v474_v23  ;;  %2881 = vmatprep.subr.msk.mxu0 %vm629_vm2, %v2554_v27  ;;  %v919_v23 = vld [vmem:[%s3939_s4 + $0x28] sm:$0xff] }
  0x2e   : > { %937 = vperm.xlu0 %3178, %v923_v24   ;;  %2854 = vmatprep.mubr.msk.f32.mxu0 %vm501_vm0, %v475_v25  ;;  %v920_v24 = vld [vmem:[%s3939_s4 + $0x30] sm:$0xff]  ;;  %v921_v25 = vld [vmem:[%s3939_s4 + $0x38] sm:$0xff] }
  0x2f   : > { %932 = vperm.xlu1 %3179, %v922_v26   ;;  %2882 = vmatpush3.msk.msra.mxu0 %vm629_vm2, %v2554_v27  ;;  %v1110_v26 = vld [vmem:[%s3941_s6 + $0x10] sm:$0xff]  ;;  %v1108_v27 = vld [vmem:[%s3941_s6] sm:$0xff] }
  0x30   : > { %2883 = vmatprep.subr.mxu0 %v2553_v32  ;;  %2867 = vmatprep.subr.mxu1 %v610_v35 }
  0x31   : > { %2855 = vmatmul.mubr.msk.f32.gmra.mxu0 %vm501_vm0, %v476_v29  ;;  %2868 = vmatpush3.msra.mxu1 %v610_v35  ;;  %vm2350_vm0 = vcmask 736256  }
  0x32   : > { %2189 = vperm.xlu0 %3178, %v2185_v30   ;;  %2884 = vmatpush3.msra.mxu0 %v2553_v32 }
  0x33   : > { %2194 = vperm.xlu1 %3179, %v2186_v31   ;;  %2885 = vmatprep.subr.mxu0 %v2552_v34 }
  0x34   : > { %2886 = vmatpush3.msra.mxu0 %v2552_v34  ;;  %2869 = vmatprep.subr.mxu1 %v609_v39 }
  0x35   : > { %2887 = vmatprep.subr.mxu0 %v2551_v36  ;;  %2870 = vmatpush3.msra.mxu1 %v609_v39 }
  0x36   : > { %2888 = vmatpush3.msra.mxu0 %v2551_v36  ;;  %2871 = vmatprep.subr.mxu1 %v608_v41 }
  0x37   : > { %2889 = vmatprep.subr.mxu0 %v2550_v37  ;;  %2872 = vmatpush3.msra.mxu1 %v608_v41 }
  0x38   : > { %2890 = vmatpush3.msra.mxu0 %v2550_v37  ;;  %2873 = vmatprep.subr.mxu1 %v607_v43 }
  0x39   : > { %2891 = vmatprep.subr.mxu0 %v2549_v38  ;;  %2874 = vmatpush3.msra.mxu1 %v607_v43 }
  0x3a   : > { %2892 = vmatpush3.msra.mxu0 %v2549_v38  ;;  %2905 = vmatprep.subr.msk.mxu1 %vm629_vm2, %v2568_v45 }
  0x3b   : > { %2893 = vmatprep.subr.mxu0 %v2548_v40 }
  0x3c   : > { %2894 = vmatpush3.msra.mxu0 %v2548_v40 }
  0x3d   : > { %2895 = vmatprep.subr.mxu0 %v2547_v42 }
  0x3e   : > { %2896 = vmatpush3.msra.mxu0 %v2547_v42 }
  0x3f   : > { %2897 = vmatprep.subr.mxu0 %v2546_v44 }
  0x40   : > { %2898 = vmatpush3.msra.mxu0 %v2546_v44 }
  0x95   : > { %v484_v46 = vpop.permute.xlu0 %483 }
  0x96   : > { %v494_v47 = vpop.permute.xlu1 %493 }
  0x99   : > { %v489_v49 = vpop.permute.xlu0 %488 }
  0x9a   : > { %v499_v53 = vpop.permute.xlu1 %498 }
  0x9d   : > { %v968_v30 = vpop.permute.xlu0 %967 }
  0x9e   : > { %v963_v32 = vpop.permute.xlu1 %962 }
  0xa1   : > { %v958_v35 = vpop.permute.xlu0 %957 }
  0xa2   : > { %v953_v37 = vpop.permute.xlu1 %952 }
  0xa5   : > { %v948_v44 = vpop.permute.xlu0 %947 }
  0xed   : > { %v2853_v48 = vpop.f32.mrf.mxu0 }
  0xee   : > { %v590_v50 = vadd.f32 %v2853_v48, %v489_v49 }
  0xef   : > { %v584_v51 = vpop.f32.mrf.mxu0 }
  0xf0   : > { %v585_v52 = vadd.f32 %v584_v51, %v484_v46  ;;  %v604_v57 = vmax.f32 %v590_v50, 0.0 }
  0xf1   : > { %v2856_v54 = vpop.f32.mrf.mxu0 }
  0xf2   : > { %v603_v55 = vmax.f32 %v585_v52, 0.0  ;;  %v600_v56 = vadd.f32 %v2856_v54, %v499_v53  ;;  %v938_v52 = vpop.permute.xlu0 %937 }
  0xf3   : > { %v594_v58 = vpop.f32.mrf.mxu0 }
  0xf4   : > { %v595_v59 = vadd.f32 %v594_v58, %v494_v47  ;;  %2875 = vmatprep.mubr.msk.f32.mxu1 %vm616_vm3, %v603_v55  ;;  %2899 = vmatprep.mubr.msk.f32.mxu0 %vm616_vm3, %v603_v55  ;;  %v606_v61 = vmax.f32 %v600_v56, 0.0  ;;  %v943_v47 = vpop.permute.xlu1 %942 }
  0xf5   : > { %2876 = vmatmul.mubr.msk.f32.vlgmr.msra.gmra.mxu1 %vm616_vm3, %v604_v57  ;;  %2900 = vmatmul.mubr.msk.f32.vlgmr.msra.gmra.mxu0 %vm616_vm3, %v604_v57 }
  0xf6   : > { %v605_v62 = vmax.f32 %v595_v59, 0.0  ;;  %2906 = vmatpush3.msk.msra.mxu1 %vm629_vm2, %v2568_v45 }
  0xf7   : > { %2907 = vmatprep.subr.mxu1 %v2567_v60 }
  0xf8   : > { %2908 = vmatpush3.msra.mxu1 %v2567_v60  ;;  %2878 = vmatprep.mubr.msk.f32.mxu1 %vm616_vm3, %v605_v62  ;;  %v1111_v60 = vld [vmem:[%s3941_s6 + $0x18] sm:$0xff] }
  0xf9   : > { %2909 = vmatprep.subr.mxu1 %v2566_v63  ;;  %2879 = vmatmul.mubr.msk.f32.gmra.mxu1 %vm616_vm3, %v606_v61 }
  0xfa   : > { %2910 = vmatpush3.msra.mxu1 %v2566_v63  ;;  %2923 = vmatprep.mubr.msk.f32.mxu1 %vm616_vm3, %v603_v55  ;;  %v933_v55 = vpop.permute.xlu1 %932  ;;  %v2625_v63 = vld [vmem:[%s3942_s7 + $0x10] sm:$0x3f] }
  0xfb   : > { %2911 = vmatprep.subr.mxu1 %v2565_v0  ;;  %2902 = vmatprep.mubr.msk.f32.mxu0 %vm616_vm3, %v605_v62 }
  0xfc   : > { %2912 = vmatpush3.msra.mxu1 %v2565_v0  ;;  %2903 = vmatmul.mubr.msk.f32.gmra.mxu0 %vm616_vm3, %v606_v61  ;;  %v1113_v0 = vld [vmem:[%s3941_s6 + $0x28] sm:$0xff] }
  0xfd   : > { %2913 = vmatprep.subr.mxu1 %v2564_v1  ;;  %2953 = vmatprep.mubr.msk.f32.mxu0 %vm970_vm4, %v914_v6  ;;  %v1119_v6 = vld [vmem:[%s3941_s6 + $0x58] sm:$0xff] }
  0xfe   : > { %2914 = vmatpush3.msra.mxu1 %v2564_v1  ;;  %v1114_v1 = vld [vmem:[%s3941_s6 + $0x30] sm:$0xff] }
  0xff   : > { %2915 = vmatprep.subr.mxu1 %v2563_v2 }
 0x100   : > { %2916 = vmatpush3.msra.mxu1 %v2563_v2  ;;  %v1115_v2 = vld [vmem:[%s3941_s6 + $0x38] sm:$0xff] }
 0x101   : > { %2917 = vmatprep.subr.mxu1 %v2562_v3 }
 0x102   : > { %2918 = vmatpush3.msra.mxu1 %v2562_v3  ;;  %v1116_v3 = vld [vmem:[%s3941_s6 + $0x40] sm:$0xff] }
 0x103   : > { %2919 = vmatprep.subr.mxu1 %v2561_v4 }
 0x104   : > { %2920 = vmatpush3.msra.mxu1 %v2561_v4  ;;  %v1117_v4 = vld [vmem:[%s3941_s6 + $0x48] sm:$0xff] }
 0x105   : > { %2921 = vmatprep.subr.mxu1 %v2560_v5 }
 0x106   : > { %2922 = vmatpush3.msra.mxu1 %v2560_v5  ;;  %v1118_v5 = vld [vmem:[%s3941_s6 + $0x50] sm:$0xff] }
 0x107   : > { %2924 = vmatmul.mubr.msk.f32.vlgmr.msra.gmra.mxu1 %vm616_vm3, %v604_v57 }
 0x108   : > { %2926 = vmatprep.mubr.msk.f32.mxu1 %vm616_vm3, %v605_v62  ;;  %v1112_v62 = vld [vmem:[%s3941_s6 + $0x20] sm:$0xff] }
 0x10b   : > { %2927 = vmatmul.mubr.msk.f32.gmra.mxu1 %vm616_vm3, %v606_v61  ;;  %v1109_v61 = vld [vmem:[%s3941_s6 + $0x8] sm:$0xff]  ;;  %vm2360_vm3 = vcmask 97280  }
 0x10c   : > { %2984 = vmatprep.mubr.msk.f32.mxu1 %vm1132_vm5, %v1110_v26 }
 0x1b5   : > { %v2877_v7 = vpop.f32.mrf.mxu1  ;;  %v2901_v13 = vpop.f32.mrf.mxu0 }
 0x1b7   : > { %v699_v8 = vpop.f32.mrf.mxu1  ;;  %v797_v16 = vpop.f32.mrf.mxu0 }
 0x1b9   : > { %v2880_v9 = vpop.f32.mrf.mxu1 }
 0x1bb   : > { %v709_v10 = vpop.f32.mrf.mxu1 }
 0x1bc   : > { %v2904_v17 = vpop.f32.mrf.mxu0 }
 0x1be   : > { %v807_v18 = vpop.f32.mrf.mxu0 }
 0x1c7   : > { %v2925_v11 = vpop.f32.mrf.mxu1 }
 0x1c9   : > { %v895_v12 = vpop.f32.mrf.mxu1 }
 0x1cb   : > { %v2928_v14 = vpop.f32.mrf.mxu1 }
 0x1cc   : > { %2929 = vmatprep.subr.mxu0 %v2928_v14 }
 0x1cd   : > { %v905_v15 = vpop.f32.mrf.mxu1  ;;  %2930 = vmatpush3.msra.mxu0 %v2928_v14  ;;  %v1127_v14 = vld [vmem:[%s3941_s6 + $0x98] sm:$0xff] }
 0x1ce   : > { %2931 = vmatprep.subr.mxu0 %v905_v15 }
 0x1cf   : > { %2932 = vmatpush3.msra.mxu0 %v905_v15  ;;  %v1128_v15 = vld [vmem:[%s3941_s6 + $0xa0] sm:$0xff] }
 0x1d0   : > { %2933 = vmatprep.subr.mxu0 %v2925_v11 }
 0x1d1   : > { %2934 = vmatpush3.msra.mxu0 %v2925_v11  ;;  %v1124_v11 = vld [vmem:[%s3941_s6 + $0x80] sm:$0xff] }
 0x1d2   : > { %2935 = vmatprep.subr.mxu0 %v895_v12 }
 0x1d3   : > { %2936 = vmatpush3.msra.mxu0 %v895_v12  ;;  %v1125_v12 = vld [vmem:[%s3941_s6 + $0x88] sm:$0xff] }
 0x1d4   : > { %2937 = vmatprep.subr.mxu0 %v2904_v17 }
 0x1d5   : > { %2938 = vmatpush3.msra.mxu0 %v2904_v17  ;;  %v1130_v17 = vld [vmem:[%s3941_s6 + $0xb0] sm:$0xff] }
 0x1d6   : > { %2939 = vmatprep.subr.mxu0 %v807_v18 }
 0x1d7   : > { %2940 = vmatpush3.msra.mxu0 %v807_v18  ;;  %v1131_v18 = vld [vmem:[%s3941_s6 + $0xb8] sm:$0xff] }
 0x1d8   : > { %2941 = vmatprep.subr.mxu0 %v2901_v13 }
 0x1d9   : > { %2942 = vmatpush3.msra.mxu0 %v2901_v13  ;;  %v1126_v13 = vld [vmem:[%s3941_s6 + $0x90] sm:$0xff] }
 0x1da   : > { %2943 = vmatprep.subr.mxu0 %v797_v16 }
 0x1db   : > { %2944 = vmatpush3.msra.mxu0 %v797_v16  ;;  %v1129_v16 = vld [vmem:[%s3941_s6 + $0xa8] sm:$0xff] }
 0x1dc   : > { %2945 = vmatprep.subr.mxu0 %v2880_v9 }
 0x1dd   : > { %2946 = vmatpush3.msra.mxu0 %v2880_v9  ;;  %v1122_v9 = vld [vmem:[%s3941_s6 + $0x70] sm:$0xff] }
 0x1de   : > { %2947 = vmatprep.subr.mxu0 %v709_v10 }
 0x1df   : > { %2948 = vmatpush3.msra.mxu0 %v709_v10  ;;  %v1123_v10 = vld [vmem:[%s3941_s6 + $0x78] sm:$0xff] }
 0x1e0   : > { %2949 = vmatprep.subr.mxu0 %v2877_v7 }
 0x1e1   : > { %2950 = vmatpush3.msra.mxu0 %v2877_v7  ;;  %v1120_v7 = vld [vmem:[%s3941_s6 + $0x60] sm:$0xff] }
 0x1e2   : > { %2951 = vmatprep.subr.mxu0 %v699_v8 }
 0x1e3   : > { %2952 = vmatpush3.msra.mxu0 %v699_v8  ;;  %v1121_v8 = vld [vmem:[%s3941_s6 + $0x68] sm:$0xff] }
 0x1e4   : > { %2954 = vmatmul.mubr.msk.f32.vlgmr.msra.gmra.mxu0 %vm970_vm4, %v915_v19  ;;  %v2606_v19 = vld [vmem:[%s3942_s7 + $0x8] sm:$0x3f] }
 0x1e5   : > { %2956 = vmatprep.mubr.msk.f32.mxu0 %vm970_vm4, %v916_v20  ;;  %v1390_v20 = vld [vmem:[%s3942_s7] sm:$0x3f] }
 0x1e8   : > { %2957 = vmatmul.mubr.msk.f32.gmra.mxu0 %vm970_vm4, %v917_v21 }
 0x1e9   : > { %2959 = vmatprep.mubr.msk.f32.mxu0 %vm970_vm4, %v918_v22 }
 0x1ec   : > { %2960 = vmatmul.mubr.msk.f32.gmra.mxu0 %vm970_vm4, %v919_v23 }
 0x1ed   : > { %2962 = vmatprep.mubr.msk.f32.mxu0 %vm970_vm4, %v920_v24 }
 0x1f0   : > { %2963 = vmatmul.mubr.msk.f32.gmra.mxu0 %vm970_vm4, %v921_v25  ;;  %vm2354_vm4 = vcmask 900096  }
 0x1f1   : > { %2981 = vmatprep.mubr.msk.f32.mxu0 %vm1132_vm5, %v1108_v27 }
 0x2a4   : > { %v2955_v28 = vpop.f32.mrf.mxu0 }
 0x2a5   : > { %v1067_v53 = vadd.f32 %v2955_v28, %v938_v52 }
 0x2a6   : > { %v1061_v29 = vpop.f32.mrf.mxu0 }
 0x2a7   : > { %v1062_v56 = vadd.f32 %v1061_v29, %v933_v55  ;;  %v1101_v58 = vmax.f32 %v1067_v53, 0.0 }
 0x2a8   : > { %v2958_v31 = vpop.f32.mrf.mxu0 }
 0x2a9   : > { %v1077_v48 = vadd.f32 %v2958_v31, %v948_v44  ;;  %v1100_v59 = vmax.f32 %v1062_v56, 0.0 }
 0x2aa   : > { %v1071_v33 = vpop.f32.mrf.mxu0 }
 0x2ab   : > { %v1072_v50 = vadd.f32 %v1071_v33, %v943_v47  ;;  %v1103_v54 = vmax.f32 %v1077_v48, 0.0  ;;  %v2645_v47 = vld [vmem:[%s3944_s9 + $0x10] sm:$0xff]  ;;  %v1824_v48 = vld [vmem:[%s3944_s9] sm:$0xff] }
 0x2ac   : > { %v2961_v34 = vpop.f32.mrf.mxu0 }
 0x2ad   : > { %v1087_v41 = vadd.f32 %v2961_v34, %v958_v35  ;;  %v1102_v57 = vmax.f32 %v1072_v50, 0.0 }
 0x2ae   : > { %v1081_v36 = vpop.f32.mrf.mxu0 }
 0x2af   : > { %v1082_v45 = vadd.f32 %v1081_v36, %v953_v37  ;;  %v1105_v49 = vmax.f32 %v1087_v41, 0.0 }
 0x2b0   : > { %v2964_v38 = vpop.f32.mrf.mxu0 }
 0x2b1   : > { %v1097_v39 = vadd.f32 %v2964_v38, %v968_v30  ;;  %v1104_v51 = vmax.f32 %v1082_v45, 0.0  ;;  %v2646_v45 = vld [vmem:[%s3944_s9 + $0x18] sm:$0x3] }
 0x2b2   : > { %v1091_v40 = vpop.f32.mrf.mxu0 }
 0x2b3   : > { %v1107_v42 = vmax.f32 %v1097_v39, 0.0  ;;  %v1092_v43 = vadd.f32 %v1091_v40, %v963_v32 }
 0x2b5   : > { %v1106_v46 = vmax.f32 %v1092_v43, 0.0  ;;  %2965 = vmatprep.subr.mxu0 %v1107_v42  ;;  %3107 = vmatprep.subr.mxu1 %v1107_v42 }
 0x2b6   : > { %2966 = vmatpush3.msra.mxu0 %v1107_v42  ;;  %3115 = vmatpush3.msra.mxu1 %v1107_v42 }
 0x2b7   : > { %2967 = vmatprep.subr.mxu0 %v1106_v46  ;;  %3108 = vmatprep.subr.mxu1 %v1106_v46 }
 0x2b8   : > { %2968 = vmatpush3.msra.mxu0 %v1106_v46  ;;  %3116 = vmatpush3.msra.mxu1 %v1106_v46  ;;  %v1825_v46 = vld [vmem:[%s3944_s9 + $0x8] sm:$0x3] }
 0x2b9   : > { %2969 = vmatprep.subr.mxu0 %v1105_v49  ;;  %3109 = vmatprep.subr.mxu1 %v1105_v49 }
 0x2ba   : > { %2970 = vmatpush3.msra.mxu0 %v1105_v49  ;;  %3117 = vmatpush3.msra.mxu1 %v1105_v49  ;;  %v2657_v49 = vld [vmem:[%s3944_s9 + $0x28] sm:$0x3] }
 0x2bb   : > { %2971 = vmatprep.subr.mxu0 %v1104_v51  ;;  %3110 = vmatprep.subr.mxu1 %v1104_v51 }
 0x2bc   : > { %2972 = vmatpush3.msra.mxu0 %v1104_v51  ;;  %3118 = vmatpush3.msra.mxu1 %v1104_v51 }
 0x2bd   : > { %2973 = vmatprep.subr.mxu0 %v1103_v54  ;;  %3111 = vmatprep.subr.mxu1 %v1103_v54 }
 0x2be   : > { %2974 = vmatpush3.msra.mxu0 %v1103_v54  ;;  %3119 = vmatpush3.msra.mxu1 %v1103_v54 }
 0x2bf   : > { %2975 = vmatprep.subr.mxu0 %v1102_v57  ;;  %3112 = vmatprep.subr.mxu1 %v1102_v57 }
 0x2c0   : > { %2976 = vmatpush3.msra.mxu0 %v1102_v57  ;;  %3120 = vmatpush3.msra.mxu1 %v1102_v57 }
 0x2c1   : > { %2977 = vmatprep.subr.mxu0 %v1101_v58  ;;  %3113 = vmatprep.subr.mxu1 %v1101_v58 }
 0x2c2   : > { %2978 = vmatpush3.msra.mxu0 %v1101_v58  ;;  %3121 = vmatpush3.msra.mxu1 %v1101_v58 }
 0x2c3   : > { %2979 = vmatprep.subr.mxu0 %v1100_v59  ;;  %3114 = vmatprep.subr.mxu1 %v1100_v59 }
 0x2c4   : > { %2980 = vmatpush3.msra.mxu0 %v1100_v59  ;;  %3122 = vmatpush3.msra.mxu1 %v1100_v59 }
 0x2c5   : > { %2985 = vmatmul.mubr.msk.f32.vlgmr.msra.gmra.mxu1 %vm1132_vm5, %v1111_v60  ;;  %2982 = vmatmul.mubr.msk.f32.vlgmr.msra.gmra.mxu0 %vm1132_vm5, %v1109_v61 }
 0x2c6   : > { %2987 = vmatprep.mubr.msk.f32.mxu1 %vm1132_vm5, %v1112_v62  ;;  %3045 = vmatprep.subr.msk.mxu1 %vm1418_vm6, %v2625_v63 }
 0x2c7   : > { %3046 = vmatpush3.msk.msra.mxu1 %vm1418_vm6, %v2625_v63  ;;  %3017 = vmatprep.subr.msk.mxu0 %vm1418_vm6, %v2606_v19 }
 0x2c8   : > { %3018 = vmatpush3.msk.msra.mxu0 %vm1418_vm6, %v2606_v19  ;;  %3075 = vmatprep.subr.msk.mxu1 %vm629_vm2, %v2646_v45 }
 0x2c9   : > { %2988 = vmatmul.mubr.msk.f32.gmra.mxu1 %vm1132_vm5, %v1113_v0  ;;  %3031 = vmatprep.subr.msk.mxu0 %vm1418_vm6, %v1390_v20  ;;  %v2635_v0 = vld [vmem:[%s3943_s8] ss:$0 sm:$0xff] }
 0x2ca   : > { %2990 = vmatprep.mubr.msk.f32.mxu1 %vm1132_vm5, %v1114_v1 }
 0x2cd   : > { %2991 = vmatmul.mubr.msk.f32.gmra.mxu1 %vm1132_vm5, %v1115_v2 }
 0x2ce   : > { %2993 = vmatprep.mubr.msk.f32.mxu1 %vm1132_vm5, %v1116_v3 }
 0x2d1   : > { %2994 = vmatmul.mubr.msk.f32.gmra.mxu1 %vm1132_vm5, %v1117_v4 }
 0x2d2   : > { %2996 = vmatprep.mubr.msk.f32.mxu1 %vm1132_vm5, %v1118_v5 }
 0x2d5   : > { %2997 = vmatmul.mubr.msk.f32.gmra.mxu1 %vm1132_vm5, %v1119_v6 }
 0x2d6   : > { %2999 = vmatprep.mubr.msk.f32.mxu1 %vm1132_vm5, %v1120_v7 }
 0x2d9   : > { %3000 = vmatmul.mubr.msk.f32.gmra.mxu1 %vm1132_vm5, %v1121_v8 }
 0x2da   : > { %3002 = vmatprep.mubr.msk.f32.mxu1 %vm1132_vm5, %v1122_v9 }
 0x2dd   : > { %3003 = vmatmul.mubr.msk.f32.gmra.mxu1 %vm1132_vm5, %v1123_v10 }
 0x2de   : > { %3005 = vmatprep.mubr.msk.f32.mxu1 %vm1132_vm5, %v1124_v11 }
 0x2e1   : > { %3006 = vmatmul.mubr.msk.f32.gmra.mxu1 %vm1132_vm5, %v1125_v12 }
 0x2e2   : > { %3008 = vmatprep.mubr.msk.f32.mxu1 %vm1132_vm5, %v1126_v13 }
 0x2e5   : > { %3009 = vmatmul.mubr.msk.f32.gmra.mxu1 %vm1132_vm5, %v1127_v14 }
 0x2e6   : > { %3011 = vmatprep.mubr.msk.f32.mxu1 %vm1132_vm5, %v1128_v15 }
 0x2e9   : > { %3012 = vmatmul.mubr.msk.f32.gmra.mxu1 %vm1132_vm5, %v1129_v16 }
 0x2ea   : > { %3014 = vmatprep.mubr.msk.f32.mxu1 %vm1132_vm5, %v1130_v17 }
 0x2ed   : > { %3015 = vmatmul.mubr.msk.f32.gmra.mxu1 %vm1132_vm5, %v1131_v18 }
 0x385   : > { %v2986_v21 = vpop.f32.mrf.mxu1  ;;  %v2983_v33 = vpop.f32.mrf.mxu0 }
 0x387   : > { %v1281_v22 = vpop.f32.mrf.mxu1  ;;  %v1271_v36 = vpop.f32.mrf.mxu0 }
 0x389   : > { %v2989_v23 = vpop.f32.mrf.mxu1 }
 0x38b   : > { %v1291_v24 = vpop.f32.mrf.mxu1 }
 0x38d   : > { %v2992_v25 = vpop.f32.mrf.mxu1 }
 0x38f   : > { %v1301_v26 = vpop.f32.mrf.mxu1 }
 0x391   : > { %v2995_v27 = vpop.f32.mrf.mxu1 }
 0x393   : > { %v1311_v28 = vpop.f32.mrf.mxu1 }
 0x394   : > { %3019 = vmatprep.mubr.msk.f32.mxu0 %vm1393_vm7, %v1311_v28 }
 0x395   : > { %v2998_v29 = vpop.f32.mrf.mxu1  ;;  %3020 = vmatmul.mubr.msk.f32.vlgmr.msra.gmra.mxu0 %vm1393_vm7, %v2995_v27 }
 0x396   : > { %3032 = vmatpush3.msk.msra.mxu0 %vm1418_vm6, %v1390_v20 }
 0x397   : > { %v1321_v30 = vpop.f32.mrf.mxu1  ;;  %3059 = vmatprep.subr.msk.mxu0 %vm629_vm2, %v1825_v46 }
 0x398   : > { %3022 = vmatprep.mubr.msk.f32.mxu0 %vm1393_vm7, %v1321_v30 }
 0x399   : > { %v3001_v31 = vpop.f32.mrf.mxu1  ;;  %3023 = vmatmul.mubr.msk.f32.gmra.mxu0 %vm1393_vm7, %v2998_v29 }
 0x39b   : > { %v1331_v32 = vpop.f32.mrf.mxu1 }
 0x39c   : > { %3025 = vmatprep.mubr.msk.f32.mxu0 %vm1393_vm7, %v1331_v32 }
 0x39d   : > { %v3004_v34 = vpop.f32.mrf.mxu1  ;;  %3026 = vmatmul.mubr.msk.f32.gmra.mxu0 %vm1393_vm7, %v3001_v31 }
 0x39f   : > { %v1341_v35 = vpop.f32.mrf.mxu1 }
 0x3a0   : > { %3028 = vmatprep.mubr.msk.f32.mxu0 %vm1393_vm7, %v1341_v35 }
 0x3a1   : > { %v3007_v37 = vpop.f32.mrf.mxu1  ;;  %3029 = vmatmul.mubr.msk.f32.gmra.mxu0 %vm1393_vm7, %v3004_v34 }
 0x3a2   : > { %3033 = vmatprep.mubr.msk.f32.mxu0 %vm1393_vm7, %v1271_v36 }
 0x3a3   : > { %v1351_v38 = vpop.f32.mrf.mxu1 }
 0x3a4   : > { %3047 = vmatprep.mubr.msk.f32.mxu1 %vm1393_vm7, %v1351_v38 }
 0x3a5   : > { %v3010_v39 = vpop.f32.mrf.mxu1  ;;  %3034 = vmatmul.mubr.msk.f32.vlgmr.msra.gmra.mxu0 %vm1393_vm7, %v2983_v33  ;;  %3048 = vmatmul.mubr.msk.f32.vlgmr.msra.gmra.mxu1 %vm1393_vm7, %v3007_v37 }
 0x3a6   : > { %3036 = vmatprep.mubr.msk.f32.mxu0 %vm1393_vm7, %v1281_v22  ;;  %3076 = vmatpush3.msk.msra.mxu1 %vm629_vm2, %v2646_v45  ;;  %v2182_v45 = vld [vmem:[%s3945_s10 + $0x8] sm:$0xff] }
 0x3a7   : > { %v1361_v40 = vpop.f32.mrf.mxu1  ;;  %3060 = vmatpush3.msk.msra.mxu0 %vm629_vm2, %v1825_v46  ;;  %3077 = vmatprep.subr.mxu1 %v2645_v47 }
 0x3a8   : > { %3050 = vmatprep.mubr.msk.f32.mxu1 %vm1393_vm7, %v1361_v40  ;;  %3061 = vmatprep.subr.mxu0 %v1824_v48 }
 0x3a9   : > { %v3013_v41 = vpop.f32.mrf.mxu1  ;;  %3037 = vmatmul.mubr.msk.f32.gmra.mxu0 %vm1393_vm7, %v2986_v21  ;;  %3051 = vmatmul.mubr.msk.f32.gmra.mxu1 %vm1393_vm7, %v3010_v39 }
 0x3aa   : > { %3039 = vmatprep.mubr.msk.f32.mxu0 %vm1393_vm7, %v1291_v24  ;;  %3078 = vmatpush3.msra.mxu1 %v2645_v47  ;;  %v2656_v24 = vld [vmem:[%s3944_s9 + $0x20] sm:$0xff] }
 0x3ab   : > { %v1371_v42 = vpop.f32.mrf.mxu1  ;;  %3062 = vmatpush3.msra.mxu0 %v1824_v48 }
 0x3ac   : > { %3053 = vmatprep.mubr.msk.f32.mxu1 %vm1393_vm7, %v1371_v42  ;;  %3091 = vmatprep.subr.msk.mxu0 %vm629_vm2, %v2657_v49 }
 0x3ad   : > { %v3016_v43 = vpop.f32.mrf.mxu1  ;;  %3040 = vmatmul.mubr.msk.f32.gmra.mxu0 %vm1393_vm7, %v2989_v23  ;;  %3054 = vmatmul.mubr.msk.f32.gmra.mxu1 %vm1393_vm7, %v3013_v41 }
 0x3ae   : > { %3042 = vmatprep.mubr.msk.f32.mxu0 %vm1393_vm7, %v1301_v26 }
 0x3af   : > { %v1381_v44 = vpop.f32.mrf.mxu1 }
 0x3b0   : > { %3056 = vmatprep.mubr.msk.f32.mxu1 %vm1393_vm7, %v1381_v44  ;;  %v3243_v44 = vmov 0.0  }
 0x3b1   : > { %3043 = vmatmul.mubr.msk.f32.gmra.mxu0 %vm1393_vm7, %v2992_v25  ;;  %3057 = vmatmul.mubr.msk.f32.gmra.mxu1 %vm1393_vm7, %v3016_v43  ;;  %vm2460_vm7 = vcmask 811008  }
 0x3b2   : > { %2203 = vmatprep.subr.mxu1 %v3243_v44 }
 0x455   : > { %v3021_v50 = vpop.f32.mrf.mxu0 }
 0x457   : > { %v1488_v51 = vpop.f32.mrf.mxu0 }
 0x459   : > { %v3024_v52 = vpop.f32.mrf.mxu0 }
 0x45b   : > { %v1498_v53 = vpop.f32.mrf.mxu0 }
 0x45d   : > { %v3027_v54 = vpop.f32.mrf.mxu0 }
 0x45f   : > { %v1508_v55 = vpop.f32.mrf.mxu0 }
 0x461   : > { %v3030_v56 = vpop.f32.mrf.mxu0 }
 0x463   : > { %v1518_v57 = vpop.f32.mrf.mxu0 }
 0x465   : > { %v3035_v58 = vpop.f32.mrf.mxu0  ;;  %v3049_v59 = vpop.f32.mrf.mxu1 }
 0x466   : > { %v1626_v60 = vadd.f32 %v3035_v58, %v3021_v50 }
 0x467   : > { %v1620_v61 = vpop.f32.mrf.mxu0  ;;  %v1754_v62 = vpop.f32.mrf.mxu1 }
 0x468   : > { %v1794_v63 = vadd.f32 %v3049_v59, %v1626_v60  ;;  %v1621_v1 = vadd.f32 %v1620_v61, %v1488_v51 }
 0x469   : > { %v3038_v2 = vpop.f32.mrf.mxu0  ;;  %v3052_v3 = vpop.f32.mrf.mxu1 }
 0x46a   : > { %v1793_v4 = vadd.f32 %v1754_v62, %v1621_v1  ;;  %v1636_v5 = vadd.f32 %v3038_v2, %v3024_v52  ;;  %v1809_v6 = vadd.f32 %v2635_v0, %v1794_v63 }
 0x46b   : > { %v1630_v7 = vpop.f32.mrf.mxu0  ;;  %v1764_v8 = vpop.f32.mrf.mxu1 }
 0x46c   : > { %v1808_v9 = vadd.f32 %v2635_v0, %v1793_v4  ;;  %v1796_v10 = vadd.f32 %v3052_v3, %v1636_v5  ;;  %v1631_v11 = vadd.f32 %v1630_v7, %v1498_v53  ;;  %v1817_v17 = vmax.f32 %v1809_v6, 0.0  ;;  %v2181_v6 = vld [vmem:[%s3945_s10] sm:$0xff]  ;;  %v2184_v7 = vld [vmem:[%s3945_s10 + $0x18] sm:$0x7f] }
 0x46d   : > { %v3041_v12 = vpop.f32.mrf.mxu0  ;;  %v3055_v13 = vpop.f32.mrf.mxu1 }
 0x46e   : > { %v1816_v14 = vmax.f32 %v1808_v9, 0.0  ;;  %v1795_v15 = vadd.f32 %v1764_v8, %v1631_v11  ;;  %v1646_v16 = vadd.f32 %v3041_v12, %v3027_v54  ;;  %v1811_v18 = vadd.f32 %v2635_v0, %v1796_v10  ;;  %v2183_v8 = vld [vmem:[%s3945_s10 + $0x10] sm:$0x7f]  ;;  %v2377_v9 = vld [vmem:[%s3947_s12 + $0x78] sm:$0xff]  ;;  %v2375_v11 = vld [vmem:[%s3947_s12 + $0x68] sm:$0xff] }
 0x46f   : > { %v1640_v19 = vpop.f32.mrf.mxu0  ;;  %v1774_v20 = vpop.f32.mrf.mxu1  ;;  %v2376_v10 = vld [vmem:[%s3947_s12 + $0x70] sm:$0xff]  ;;  %v2374_v12 = vld [vmem:[%s3947_s12 + $0x60] sm:$0xff] }
 0x470   : > { %v1810_v21 = vadd.f32 %v2635_v0, %v1795_v15  ;;  %v1798_v22 = vadd.f32 %v3055_v13, %v1646_v16  ;;  %v1641_v23 = vadd.f32 %v1640_v19, %v1508_v55  ;;  %3063 = vmatprep.mubr.msk.f32.mxu0 %vm1826_vm8, %v1816_v14  ;;  %3079 = vmatprep.mubr.msk.f32.mxu1 %vm1826_vm8, %v1816_v14  ;;  %v1819_v30 = vmax.f32 %v1811_v18, 0.0  ;;  %v2373_v13 = vld [vmem:[%s3947_s12 + $0x58] sm:$0xff]  ;;  %v2371_v15 = vld [vmem:[%s3947_s12 + $0x48] sm:$0xff]  ;;  %v2370_v16 = vld [vmem:[%s3947_s12 + $0x40] sm:$0xff]  ;;  %v2190_v19 = vpop.permute.xlu0 %2189 }
 0x471   : > { %v3044_v25 = vpop.f32.mrf.mxu0  ;;  %v3058_v26 = vpop.f32.mrf.mxu1  ;;  %3064 = vmatmul.mubr.msk.f32.vlgmr.msra.gmra.mxu0 %vm1826_vm8, %v1817_v17  ;;  %3080 = vmatmul.mubr.msk.f32.vlgmr.msra.gmra.mxu1 %vm1826_vm8, %v1817_v17  ;;  %v2368_v18 = vld [vmem:[%s3947_s12 + $0x30] sm:$0xff] }
 0x472   : > { %v1818_v27 = vmax.f32 %v1810_v21, 0.0  ;;  %v1797_v28 = vadd.f32 %v1774_v20, %v1641_v23  ;;  %v1656_v29 = vadd.f32 %v3044_v25, %v3030_v56  ;;  %3092 = vmatpush3.msk.msra.mxu0 %vm629_vm2, %v2657_v49  ;;  %v1813_v31 = vadd.f32 %v2635_v0, %v1798_v22  ;;  %v2367_v21 = vld [vmem:[%s3947_s12 + $0x28] sm:$0xff]  ;;  %v2366_v22 = vld [vmem:[%s3947_s12 + $0x20] sm:$0xff] }
 0x473   : > { %v1650_v32 = vpop.f32.mrf.mxu0  ;;  %3093 = vmatprep.subr.mxu0 %v2656_v24  ;;  %v1784_v36 = vpop.f32.mrf.mxu1  ;;  %vm2352_vm2 = vcmask 818176  }
 0x474   : > { %v1812_v33 = vadd.f32 %v2635_v0, %v1797_v28  ;;  %v1800_v34 = vadd.f32 %v3058_v26, %v1656_v29  ;;  %v1651_v35 = vadd.f32 %v1650_v32, %v1518_v57  ;;  %3066 = vmatprep.mubr.msk.f32.mxu0 %vm1826_vm8, %v1818_v27  ;;  %3082 = vmatprep.mubr.msk.f32.mxu1 %vm1826_vm8, %v1818_v27  ;;  %v1821_v39 = vmax.f32 %v1813_v31, 0.0  ;;  %v2365_v28 = vld [vmem:[%s3947_s12 + $0x18] sm:$0xff]  ;;  %v2364_v29 = vld [vmem:[%s3947_s12 + $0x10] sm:$0xff] }
 0x475   : > { %3067 = vmatmul.mubr.msk.f32.gmra.mxu0 %vm1826_vm8, %v1819_v30  ;;  %3083 = vmatmul.mubr.msk.f32.gmra.mxu1 %vm1826_vm8, %v1819_v30 }
 0x476   : > { %v1820_v37 = vmax.f32 %v1812_v33, 0.0  ;;  %v1799_v38 = vadd.f32 %v1784_v36, %v1651_v35  ;;  %3094 = vmatpush3.msra.mxu0 %v2656_v24  ;;  %v1815_v40 = vadd.f32 %v2635_v0, %v1800_v34  ;;  %v2363_v33 = vld [vmem:[%s3947_s12 + $0x8] sm:$0xff]  ;;  %v2362_v36 = vld [vmem:[%s3947_s12] sm:$0xff] }
 0x477   : > { %2389 = vmatprep.subr.mxu0 %v3243_v44 }
 0x478   : > { %v1814_v41 = vadd.f32 %v2635_v0, %v1799_v38  ;;  %3069 = vmatprep.mubr.msk.f32.mxu0 %vm1826_vm8, %v1820_v37  ;;  %3085 = vmatprep.mubr.msk.f32.mxu1 %vm1826_vm8, %v1820_v37  ;;  %v1823_v43 = vmax.f32 %v1815_v40, 0.0  ;;  %v2195_v38 = vpop.permute.xlu1 %2194 }
 0x479   : > { %3070 = vmatmul.mubr.msk.f32.gmra.mxu0 %vm1826_vm8, %v1821_v39  ;;  %3086 = vmatmul.mubr.msk.f32.gmra.mxu1 %vm1826_vm8, %v1821_v39 }
 0x47a   : > { %v1822_v42 = vmax.f32 %v1814_v41, 0.0  ;;  %v2379_v41 = vld [vmem:[%s3947_s12 + $0x88] sm:$0xff] }
 0x47c   : > { %3072 = vmatprep.mubr.msk.f32.mxu0 %vm1826_vm8, %v1822_v42  ;;  %3088 = vmatprep.mubr.msk.f32.mxu1 %vm1826_vm8, %v1822_v42 }
 0x47d   : > { %3073 = vmatmul.mubr.msk.f32.gmra.mxu0 %vm1826_vm8, %v1823_v43  ;;  %3089 = vmatmul.mubr.msk.f32.gmra.mxu1 %vm1826_vm8, %v1823_v43 }
 0x47e   : > { %3095 = vmatprep.mubr.msk.f32.mxu0 %vm1826_vm8, %v1816_v14  ;;  %2667 = vmatprep.mubr.msk.f32.mxu1 %vm1132_vm5, %v2182_v45  ;;  %v2372_v14 = vld [vmem:[%s3947_s12 + $0x50] sm:$0xff]  ;;  %v2378_v45 = vld [vmem:[%s3947_s12 + $0x80] sm:$0xff] }
 0x481   : > { %3096 = vmatmul.mubr.msk.f32.vlgmr.msra.gmra.mxu0 %vm1826_vm8, %v1817_v17  ;;  %v2369_v17 = vld [vmem:[%s3947_s12 + $0x38] sm:$0xff] }
 0x482   : > { %3098 = vmatprep.mubr.msk.f32.mxu0 %vm1826_vm8, %v1818_v27  ;;  %2390 = vmatpush1.msra.mxu0 %v2377_v9 }
 0x483   : > { %2391 = vmatprep.subr.mxu0 %v3243_v44 }
 0x484   : > { %2392 = vmatpush1.msra.mxu0 %v2376_v10 }
 0x485   : > { %3099 = vmatmul.mubr.msk.f32.gmra.mxu0 %vm1826_vm8, %v1819_v30  ;;  %2393 = vmatprep.subr.mxu0 %v3243_v44 }
 0x486   : > { %3101 = vmatprep.mubr.msk.f32.mxu0 %vm1826_vm8, %v1820_v37  ;;  %2394 = vmatpush1.msra.mxu0 %v2375_v11  ;;  %v2380_v37 = vld [vmem:[%s3947_s12 + $0x90] sm:$0x3f] }
 0x487   : > { %2395 = vmatprep.subr.mxu0 %v3243_v44 }
 0x488   : > { %2396 = vmatpush1.msra.mxu0 %v2374_v12 }
 0x489   : > { %3102 = vmatmul.mubr.msk.f32.gmra.mxu0 %vm1826_vm8, %v1821_v39  ;;  %2397 = vmatprep.subr.mxu0 %v3243_v44 }
 0x48a   : > { %3104 = vmatprep.mubr.msk.f32.mxu0 %vm1826_vm8, %v1822_v42  ;;  %2398 = vmatpush1.msra.mxu0 %v2373_v13  ;;  %v2381_v13 = vld [vmem:[%s3948_s13] sm:$0x1] }
 0x48b   : > { %2399 = vmatprep.subr.mxu0 %v3243_v44 }
 0x48c   : > { %2400 = vmatpush1.msra.mxu0 %v2372_v14 }
 0x48d   : > { %3105 = vmatmul.mubr.msk.f32.gmra.mxu0 %vm1826_vm8, %v1823_v43  ;;  %2401 = vmatprep.subr.mxu0 %v3243_v44 }
 0x48e   : > { %2402 = vmatpush1.msra.mxu0 %v2371_v15 }
 0x48f   : > { %2403 = vmatprep.subr.mxu0 %v3243_v44 }
 0x490   : > { %2404 = vmatpush1.msra.mxu0 %v2370_v16 }
 0x491   : > { %2405 = vmatprep.subr.mxu0 %v3243_v44 }
 0x492   : > { %2406 = vmatpush1.msra.mxu0 %v2369_v17 }
 0x493   : > { %2407 = vmatprep.subr.mxu0 %v3243_v44 }
 0x494   : > { %2408 = vmatpush1.msra.mxu0 %v2368_v18 }
 0x495   : > { %2409 = vmatprep.subr.mxu0 %v3243_v44 }
 0x496   : > { %2410 = vmatpush1.msra.mxu0 %v2367_v21 }
 0x497   : > { %2411 = vmatprep.subr.mxu0 %v3243_v44 }
 0x498   : > { %2412 = vmatpush1.msra.mxu0 %v2366_v22 }
 0x499   : > { %2413 = vmatprep.subr.mxu0 %v3243_v44 }
 0x49a   : > { %2414 = vmatpush1.msra.mxu0 %v2365_v28 }
 0x49b   : > { %2415 = vmatprep.subr.mxu0 %v3243_v44 }
 0x49c   : > { %2416 = vmatpush1.msra.mxu0 %v2364_v29 }
 0x49d   : > { %2417 = vmatprep.subr.mxu0 %v3243_v44 }
 0x49e   : > { %2418 = vmatpush1.msra.mxu0 %v2363_v33 }
 0x49f   : > { %2419 = vmatprep.subr.mxu0 %v3243_v44 }
 0x4a0   : > { %2420 = vmatpush1.msra.mxu0 %v2362_v36 }
 0x4a1   : > { %2447 = vmatprep.subr.mxu0 %v3243_v44 }
 0x4a2   : > { %2669 = vmatpush2.msk.msra.mxu0 %vm1418_vm6, %v2380_v37  ;;  %vm2382_vm6 = vcmask 179200  }
 0x4a3   : > { %2449 = vmatprep.subr.mxu0 %v3243_v44 }
 0x4a4   : > { %2450 = vmatpush2.msra.mxu0 %v2379_v41 }
 0x4a5   : > { %2451 = vmatprep.subr.mxu0 %v3243_v44 }
 0x4a6   : > { %2452 = vmatpush2.msra.mxu0 %v2378_v45 }
 0x531   : > { %v3065_v46 = vpop.f32.mrf.mxu0  ;;  %v3081_v47 = vpop.f32.mrf.mxu1 }
 0x533   : > { %v1920_v48 = vpop.f32.mrf.mxu0  ;;  %v2031_v49 = vpop.f32.mrf.mxu1 }
 0x535   : > { %v3068_v50 = vpop.f32.mrf.mxu0  ;;  %v3084_v51 = vpop.f32.mrf.mxu1 }
 0x537   : > { %v1930_v52 = vpop.f32.mrf.mxu0  ;;  %v2041_v53 = vpop.f32.mrf.mxu1 }
 0x539   : > { %v3071_v54 = vpop.f32.mrf.mxu0  ;;  %v3087_v55 = vpop.f32.mrf.mxu1 }
 0x53b   : > { %v1940_v56 = vpop.f32.mrf.mxu0  ;;  %v2051_v57 = vpop.f32.mrf.mxu1 }
 0x53d   : > { %v3074_v58 = vpop.f32.mrf.mxu0  ;;  %v3090_v59 = vpop.f32.mrf.mxu1 }
 0x53e   : > { %2204 = vmatpush1.msra.mxu1 %v3090_v59 }
 0x53f   : > { %v1950_v60 = vpop.f32.mrf.mxu0  ;;  %v2061_v61 = vpop.f32.mrf.mxu1  ;;  %2205 = vmatprep.subr.mxu1 %v3243_v44 }
 0x540   : > { %2206 = vmatpush1.msra.mxu1 %v2061_v61 }
 0x541   : > { %2207 = vmatprep.subr.mxu1 %v3243_v44  ;;  %v3097_v62 = vpop.f32.mrf.mxu0 }
 0x542   : > { %2208 = vmatpush1.msra.mxu1 %v3087_v55 }
 0x543   : > { %2209 = vmatprep.subr.mxu1 %v3243_v44  ;;  %v2142_v63 = vpop.f32.mrf.mxu0 }
 0x544   : > { %2210 = vmatpush1.msra.mxu1 %v2051_v57 }
 0x545   : > { %2211 = vmatprep.subr.mxu1 %v3243_v44  ;;  %v3100_v0 = vpop.f32.mrf.mxu0 }
 0x546   : > { %2212 = vmatpush1.msra.mxu1 %v3084_v51 }
 0x547   : > { %2213 = vmatprep.subr.mxu1 %v3243_v44  ;;  %v2152_v1 = vpop.f32.mrf.mxu0 }
 0x548   : > { %2214 = vmatpush1.msra.mxu1 %v2041_v53 }
 0x549   : > { %2215 = vmatprep.subr.mxu1 %v3243_v44  ;;  %v3103_v2 = vpop.f32.mrf.mxu0 }
 0x54a   : > { %2216 = vmatpush1.msra.mxu1 %v3081_v47 }
 0x54b   : > { %2217 = vmatprep.subr.mxu1 %v3243_v44  ;;  %v2162_v3 = vpop.f32.mrf.mxu0 }
 0x54c   : > { %2218 = vmatpush1.msra.mxu1 %v2031_v49 }
 0x54d   : > { %2219 = vmatprep.subr.mxu1 %v3243_v44  ;;  %v3106_v4 = vpop.f32.mrf.mxu0 }
 0x54e   : > { %2220 = vmatpush1.msra.mxu1 %v3074_v58 }
 0x54f   : > { %2221 = vmatprep.subr.mxu1 %v3243_v44  ;;  %v2172_v5 = vpop.f32.mrf.mxu0 }
 0x550   : > { %2222 = vmatpush1.msra.mxu1 %v1950_v60 }
 0x551   : > { %2223 = vmatprep.subr.mxu1 %v3243_v44 }
 0x552   : > { %2224 = vmatpush1.msra.mxu1 %v3071_v54 }
 0x553   : > { %2225 = vmatprep.subr.mxu1 %v3243_v44 }
 0x554   : > { %2226 = vmatpush1.msra.mxu1 %v1940_v56 }
 0x555   : > { %2227 = vmatprep.subr.mxu1 %v3243_v44 }
 0x556   : > { %2228 = vmatpush1.msra.mxu1 %v3068_v50 }
 0x557   : > { %2229 = vmatprep.subr.mxu1 %v3243_v44 }
 0x558   : > { %2230 = vmatpush1.msra.mxu1 %v1930_v52 }
 0x559   : > { %2231 = vmatprep.subr.mxu1 %v3243_v44 }
 0x55a   : > { %2232 = vmatpush1.msra.mxu1 %v3065_v46 }
 0x55b   : > { %2233 = vmatprep.subr.mxu1 %v3243_v44 }
 0x55c   : > { %2234 = vmatpush1.msra.mxu1 %v1920_v48 }
 0x55d   : > { %2251 = vmatprep.subr.mxu1 %v3243_v44 }
 0x55e   : > { %2252 = vmatpush2.msra.mxu1 %v3106_v4 }
 0x55f   : > { %2253 = vmatprep.subr.mxu1 %v3243_v44 }
 0x560   : > { %2254 = vmatpush2.msra.mxu1 %v2172_v5 }
 0x561   : > { %2255 = vmatprep.subr.mxu1 %v3243_v44 }
 0x562   : > { %2256 = vmatpush2.msra.mxu1 %v3103_v2 }
 0x563   : > { %2257 = vmatprep.subr.mxu1 %v3243_v44 }
 0x564   : > { %2258 = vmatpush2.msra.mxu1 %v2162_v3 }
 0x565   : > { %2259 = vmatprep.subr.mxu1 %v3243_v44 }
 0x566   : > { %2260 = vmatpush2.msra.mxu1 %v3100_v0 }
 0x567   : > { %2261 = vmatprep.subr.mxu1 %v3243_v44 }
 0x568   : > { %2262 = vmatpush2.msra.mxu1 %v2152_v1 }
 0x569   : > { %2263 = vmatprep.subr.mxu1 %v3243_v44 }
 0x56a   : > { %2264 = vmatpush2.msra.mxu1 %v3097_v62 }
 0x56b   : > { %2265 = vmatprep.subr.mxu1 %v3243_v44 }
 0x56c   : > { %2266 = vmatpush2.msra.mxu1 %v2142_v63 }
 0x56d   : > { %2268 = vmatmul.mubr.f32.vlgmr.msra.gmra.mxu1 %v2181_v6 }
 0x56e   : > { %2668 = vmatprep.mubr.msk.f32.mxu1 %vm1132_vm5, %v2184_v7  ;;  %vm2356_vm5 = vcmask 982016  }
 0x571   : > { %2273 = vmatmul.mubr.f32.gmra.mxu1 %v2183_v8 }
 0x62d   : > { %v2269_v20 = vpop.f32.mrf.mxu1 }
 0x62e   : > { %v3857_v23 = vadd.f32 %v2269_v20, %v2190_v19 }
 0x62f   : > { %v2271_v24 = vpop.f32.mrf.mxu1 }
 0x630   : > { %v2283_v25 = vrot.slane %v3857_v23, 2  ;;  %v2279_v26 = vrot.slane %v3857_v23, 1  ;;  %v2291_v31 = vrot.slane %v3857_v23, 4  ;;  %v2287_v32 = vrot.slane %v3857_v23, 3 }
 0x631   : > { %v2274_v27 = vpop.f32.mrf.mxu1  ;;  %v2299_v34 = vrot.slane %v3857_v23, 6  ;;  %v2295_v35 = vrot.slane %v3857_v23, 5  ;;  %v2303_v40 = vrot.slane %v3857_v23, 7 }
 0x632   : > { %2284 = vrot.lane.b32.xlu1 %v2283_v25, %s3244_s15  ;;  %2280 = vrot.lane.b32.xlu0 %v2279_v26, %s3245_s27  ;;  %s3249_s15 = smov 50   ;;  %v2275_v39 = vadd.f32 %v2274_v27, %v2195_v38  ;;  %s3255_s27 = smov 120  }
 0x633   : > { %v2276_v30 = vpop.f32.mrf.mxu1 }
 0x634   : > { %v2315_v42 = vrot.slane %v2275_v39, 2  ;;  %v2311_v43 = vrot.slane %v2275_v39, 1  ;;  %v2327_v46 = vrot.slane %v2275_v39, 5  ;;  %v2323_v47 = vrot.slane %v2275_v39, 4 }
 0x635   : > { %v2331_v48 = vrot.slane %v2275_v39, 6  ;;  %v2319_v49 = vrot.slane %v2275_v39, 3 }
 0x636   : > { %2292 = vrot.lane.b32.xlu1 %v2291_v31, %s3246_s25  ;;  %2288 = vrot.lane.b32.xlu0 %v2287_v32, %s3247_s26  ;;  %s3251_s25 = smov 70   ;;  %s2671_s26 = sshll.u32 %s3355_s17, 4 }
 0x63a   : > { %2300 = vrot.lane.b32.xlu1 %v2299_v34, %s3248_s20  ;;  %2296 = vrot.lane.b32.xlu0 %v2295_v35, %s3249_s15  ;;  %s3253_s20 = smov 90   ;;  %s3254_s15 = smov 2  }
 0x63e   : > { %2308 = vrot.lane.b32.xlu1 %v2275_v39, %s3250_s21  ;;  %2304 = vrot.lane.b32.xlu0 %v2303_v40, %s3251_s25  ;;  %s3258_s21 = smov [#allocation2]  }
 0x63f   : > { %s3184_s17 = sshll.u32 %s3258_s21, 4  ;;  %s3185_s17 = int_to_ptr.vmem [resolvable:$false] %s3184_s17 }
 0x640   : > { %s3186_s25 = scalar_lea.vmem %s3185_s17, 32 }
 0x642   : > { %2316 = vrot.lane.b32.xlu1 %v2315_v42, %s3252_s18  ;;  %2312 = vrot.lane.b32.xlu0 %v2311_v43, %s3253_s20  ;;  %s2475_s18 = sshll.u32 %s459_s28, 4  ;;  %s2476_s18 = int_to_ptr.vmem [resolvable:$true] %s2475_s18 }
 0x643   : > { %p3187_p0 = scmp.lt.s32.totalorder %s2476_s18, %s3185_s17 }
 0x646   : > { %2328 = vrot.lane.b32.xlu1 %v2327_v46, %s3254_s15  ;;  %2324 = vrot.lane.b32.xlu0 %v2323_v47, %s3255_s27  ;;  %s2473_s27 = scalar_lea.hbm %s3949_s14, %s2671_s26 }
 0x64a   : > { %2332 = vrot.lane.b32.xlu1 %v2331_v48, %s3256_s19  ;;  %2320 = vrot.lane.b32.xlu0 %v2319_v49, %s3257_s22  ;;  %s2463_s19 = scalar_lea.sflag [#allocation3], %s458_s24  ;;  %s3180_s22 = scalar_lea.vmem %s2476_s18, 16 }
 0x64b   : > { %p3181_p11 = scmp.ne.s32.totalorder %s2476_s18, %s3180_s22  ;;  %p3188_p1 = scmp.lt.s32.totalorder %s3186_s25, %s3180_s22 }
 0x64d   : > { %p3182_p12 = pnand %p3181_p11, %p3372_p5  ;;  %p3189_p2 = por %p3188_p1, %p3187_p0 }
 0x64f   : > { %p3183_p13 = pneg %p3182_p12 }
 0x651   : > { %p3190_p3 = pnand %p3189_p2, %p3183_p13 }
 0x6a4   : > { %v2285_v50 = vpop.permute.xlu1 %2284  ;;  %v2281_v51 = vpop.permute.xlu0 %2280 }
 0x6a5   : > { %v2335_v53 = vsel %vm1826_vm8, %v3857_v23, %v2281_v51 }
 0x6a6   : > { %v2337_v54 = vsel %vm2336_vm9, %v2335_v53, %v2285_v50 }
 0x6a8   : > { %v2293_v44 = vpop.permute.xlu1 %2292  ;;  %v2289_v52 = vpop.permute.xlu0 %2288 }
 0x6a9   : > { %v2339_v57 = vsel %vm2338_vm10, %v2337_v54, %v2289_v52 }
 0x6aa   : > { %v2341_v58 = vsel %vm2340_vm11, %v2339_v57, %v2293_v44 }
 0x6ac   : > { %v2301_v55 = vpop.permute.xlu1 %2300  ;;  %v2297_v56 = vpop.permute.xlu0 %2296 }
 0x6ad   : > { %v2343_v61 = vsel %vm2342_vm12, %v2341_v58, %v2297_v56 }
 0x6ae   : > { %v2345_v62 = vsel %vm2344_vm13, %v2343_v61, %v2301_v55 }
 0x6b0   : > { %v2309_v59 = vpop.permute.xlu1 %2308  ;;  %v2305_v60 = vpop.permute.xlu0 %2304 }
 0x6b1   : > { %v2347_v1 = vsel %vm2346_vm14, %v2345_v62, %v2305_v60 }
 0x6b2   : > { %v2349_v2 = vsel %vm2348_vm15, %v2347_v1, %v2309_v59 }
 0x6b4   : > { %v2317_v63 = vpop.permute.xlu1 %2316  ;;  %v2313_v0 = vpop.permute.xlu0 %2312 }
 0x6b5   : > { %v2351_v5 = vsel %vm2350_vm0, %v2349_v2, %v2313_v0 }
 0x6b6   : > { %v2353_v8 = vsel %vm2352_vm2, %v2351_v5, %v2317_v63 }
 0x6b8   : > { %v2329_v3 = vpop.permute.xlu1 %2328  ;;  %v2325_v4 = vpop.permute.xlu0 %2324 }
 0x6b9   : > { %v2359_v6 = vsel %vm2358_vm1, %v2325_v4, %v2329_v3 }
 0x6bc   : > { %v2333_v7 = vpop.permute.xlu1 %2332  ;;  %v2321_v9 = vpop.permute.xlu0 %2320 }
 0x6bd   : > { %v2361_v10 = vsel %vm2360_vm3, %v2359_v6, %v2333_v7  ;;  %v2355_v11 = vsel %vm2354_vm4, %v2353_v8, %v2321_v9 }
 0x6be   : > { %v2357_v12 = vsel %vm2356_vm5, %v2355_v11, %v2325_v4  ;;  %2670 = vmatprep.mubr.msk.f32.mxu0 %vm2382_vm6, %v2361_v10 }
 0x6bf   : > { %2454 = vmatmul.mubr.f32.vlgmr.msra.gmra.mxu0 %v2357_v12 }
 0x77f   : > { %v2455_v14 = vpop.f32.mrf.mxu0 }
 0x780   : > { %v2456_v15 = vadd.f32 %v2455_v14, %v2381_v13 }
 0x781   : > { %v2457_v16 = vpop.f32.mrf.mxu0 }
 0x782   : > { %v2459_v17 = vmax.f32 %v2456_v15, 0.0 }
 0x784   : > { %2461 = vst.msk [vmem:[%s459_s28] sm:$0x1] %vm2460_vm7, %v2459_v17 }
 0x785   : > { %3193 = shalt.err (!%p3190_p3)
}
 0x786   : > { %s3194_s0 = scalar_lea.hbm %s2473_s27, 16  ;;  %s3198_s28 = scalar_lea.hbm %s3949_s14, 32 }
 0x787   : > { %p3195_p4 = scmp.ne.s32.totalorder %s2473_s27, %s3194_s0  ;;  %p3199_p9 = scmp.lt.s32.totalorder %s2473_s27, %s3949_s14 }
 0x788   : > { %p3200_p10 = scmp.lt.s32.totalorder %s3198_s28, %s3194_s0 }
 0x789   : > { %p3196_p7 = pnand %p3195_p4, %p3372_p5 }
 0x78a   : > { %p3201_p11 = por %p3200_p10, %p3199_p9 }
 0x78b   : > { %p3197_p8 = pneg %p3196_p7 }
 0x78d   : > { %p3202_p12 = pnand %p3201_p11, %p3197_p8 }
 0x78f   : > { %3205 = shalt.err (!%p3202_p12)
}
 0x790   : > { %3123 = dma.vmem_to_hbm [thread:$0]  (%p3372_p5), %s2476_s18, 16, %s2473_s27, %s2463_s19  }
 0x791 PF: > { %p3129_p13 = scmp.ge.s32.totalorder %s3240_s16, 2  ;;  %s2487_s21 = sand.u32 1, %s3228_s29  }
 0x792   : > { %s2488_s17 = scalar_lea.sflag [#allocation3], %s2487_s21 }
 0x793   : > { %p3126_p0 = pnand %p3129_p13, %p3376_p6 }
 0x795   : > { %p3127_p1 = pneg %p3126_p0 }
 0x797   : > { %3223 = dma.done.wait (%p3127_p1), %s2488_s17, 16  }
 0x798   : > { %3225 = vsyncadd (%p3127_p1), %s2488_s17, 4294967280  ;;  %s3963_s16 = sld [smem:[#allocation6_spill]]  ;;  %s3966_s29 = smov %s3232_s30 }
 0x799   : > { %s3964_s0 = sld [smem:[#allocation5_spill]] }
 0x79a   : > { %s3965_s15 = sld [smem:[#allocation7_spill]] }
 0x79e   : > { %p24_p2 = scmp.ge.s32.totalorder %s3963_s16, 4  }
 0x79f   : > { %s3967_s30 = smov %s3964_s0 }
 0x7a0   :  { %26 = sbr.rel (!%p24_p2) target bundleno = 5 (0x5), region = 117 }
 0x7a5   :  { %2492 = vsyncpa [#allocation3], 1 }
 0x7a6   :  { %2494 = vsyncpa [#allocation3 + $0x1], 1 }

</bundles_post_ra>
